<compile_context>
chip_gen: v6e
topology: v6e:2x2x1
jax: 0.10.0
libtpu: 0.0.40
codegen_flags: <defaults>
</compile_context>

<pallas_src>
import functools

import jax
import jax.numpy as jnp
from jax import lax
from jax.experimental import pallas as pl
from jax.experimental.pallas import tpu as pltpu

# bf16 operands on the MXU (f32 accumulation).  Set to jnp.float32 to match the
# f32 PyTorch reference bit-for-bit (the __main__ check adapts its tolerance).
MATMUL_DTYPE = jnp.bfloat16


def _mm(a, b):
    # Operands are normally already MATMUL_DTYPE (cast before the halo build /
    # in the wrapper); the astype is a no-op in that case.
    return jnp.dot(a.astype(MATMUL_DTYPE), b.astype(MATMUL_DTYPE),
                   preferred_element_type=jnp.float32)


# ----------------------------------------------------------------------------
# In-kernel 3x3 "same" convolution of an NHWC value (halo built in-VMEM).
# ----------------------------------------------------------------------------
def _conv3x3_nhwc(x, w_ref, bias=None):
    """x: (Bb, H, W, Cin) value, already cast to MATMUL_DTYPE (so every halo
    temporary is narrow).  w_ref: (3, 3*Cin, Cout) with (dy)(dx, cin) packing.
    bias: optional (1, Cout) f32.  Returns (Bb*H*W, Cout) float32."""
    Bb, H, W, Cin = x.shape
    zc = jnp.zeros((Bb, H, 1, Cin), x.dtype)
    xw = jnp.concatenate([zc, x, zc], axis=2)                      # (Bb, H, W+2, Cin)
    # dx = -1, 0, +1 folded into the channel (lane) dimension.
    xcat = jnp.concatenate(
        [xw[:, :, 0:W], xw[:, :, 1:W + 1], xw[:, :, 2:W + 2]], axis=3)  # (Bb, H, W, 3Cin)
    zr = jnp.zeros((Bb, 1, W, 3 * Cin), x.dtype)
    xp = jnp.concatenate([zr, xcat, zr], axis=1)                   # (Bb, H+2, W, 3Cin)

    # dy taps: the first tap ASSIGNS the accumulator (no zeros-init + add).
    y = _mm(xp[:, 0:H].reshape(Bb * H * W, 3 * Cin), w_ref[0])
    y = y + _mm(xp[:, 1:H + 1].reshape(Bb * H * W, 3 * Cin), w_ref[1])
    y = y + _mm(xp[:, 2:H + 2].reshape(Bb * H * W, 3 * Cin), w_ref[2])
    if bias is not None:
        y = y + bias
    return y


# ----------------------------------------------------------------------------
# Kernels
# ----------------------------------------------------------------------------
def _conv_s2d_relu_kernel(x_ref, w_ref, b_ref, o_ref):
    """Conv2d(k=4, s=2, p=1) rewritten as a 3x3/s=1 conv on the s2d input, + ReLU."""
    Bb, H, W, _ = x_ref.shape
    Cout = w_ref.shape[-1]
    x = x_ref[...].astype(MATMUL_DTYPE)                 # cast BEFORE the halo build
    y = _conv3x3_nhwc(x, w_ref, b_ref[...])             # (Bb*H*W, Cout) f32
    y = jnp.maximum(y, 0.0)
    o_ref[...] = y.reshape(Bb, H, W, Cout).astype(o_ref.dtype)


def _fused_tail_kernel(x_ref, wc2_ref, bc2_ref, wc3_ref, bc3_ref,
                       wr3_ref, wr1_ref, wpq_ref, bpq_ref, o_ref, *, n_res_layers):
    """conv2(+ReLU) -> conv3 -> n_res_layers x residual layer -> ReLU -> 1x1 prequant.

    The activation block is read from HBM exactly once; everything below lives
    in VMEM.  All the (tiny, shared) weights are resident for the whole kernel.
    """
    Bb, H, W, _ = x_ref.shape
    hd = wc3_ref.shape[-1]
    emb = wpq_ref.shape[-1]

    x = x_ref[...]                                                   # MATMUL_DTYPE, read once

    # Conv2d(h/2, h, k=4, s=2, p=1) + ReLU  (as a 3x3 conv over the s2d input)
    h = jnp.maximum(_conv3x3_nhwc(x, wc2_ref, bc2_ref[...]), 0.0)    # (M, h) f32

    # Conv2d(h, h, k=3, s=1, p=1)  (no ReLU before the residual stack)
    h = _conv3x3_nhwc(h.astype(MATMUL_DTYPE).reshape(Bb, H, W, hd),
                      wc3_ref, bc3_ref[...])                         # (M, h) f32

    # ResidualStack: n_res_layers applications of ONE shared-weight layer.
    for _ in range(n_res_layers):
        a = jnp.maximum(h, 0.0).astype(MATMUL_DTYPE).reshape(Bb, H, W, hd)
        r = jnp.maximum(_conv3x3_nhwc(a, wr3_ref), 0.0)              # (M, res_h) f32
        h = h + _mm(r.astype(MATMUL_DTYPE), wr1_ref[...])            # residual add in f32

    # ResidualStack final ReLU fused with the 1x1 pre-quantization conv.
    y = _mm(jnp.maximum(h, 0.0).astype(MATMUL_DTYPE), wpq_ref[...]) + bpq_ref[...]
    o_ref[...] = y.reshape(Bb, H, W, emb).astype(o_ref.dtype)


# ----------------------------------------------------------------------------
# VMEM accounting (tiled layout) and block selection
# ----------------------------------------------------------------------------
def _round_up(x, m):
    return (x + m - 1) // m * m


def _tiled_bytes(shape, itemsize):
    """VMEM footprint in the TPU tiled layout: last dim padded to 128 lanes,
    second-to-last to 8 sublanes (conservative for sub-32-bit types)."""
    *major, s, l = shape
    n = 1
    for d in major:
        n *= d
    return n * _round_up(max(s, 1), 8) * _round_up(max(l, 1), 128) * itemsize


@functools.lru_cache(maxsize=None)
def _vmem_limit_bytes():
    try:
        cap = int(pltpu.get_tpu_info().vmem_capacity_bytes)
    except Exception:
        cap = 64 * 1024 * 1024          # conservative default (v7x-sized)
    # Leave headroom for compiler scratch / pipelining: ~96 MiB on 128 MiB
    # parts (v5e/v6e), ~48 MiB on 64 MiB parts (v7x).
    return max(32 << 20, min(cap * 3 // 4, 100 << 20))


def _compiler_params():
    return pltpu.CompilerParams(dimension_semantics=("parallel",),
                                vmem_limit_bytes=_vmem_limit_bytes())


def _conv3x3_halo_bytes(bb, H, W, Cin, Cout):
    """In-kernel temporaries of one 3x3 conv: MATMUL_DTYPE halo copies plus the
    f32 matmul result and one elementwise copy of it."""
    mm = jnp.dtype(MATMUL_DTYPE).itemsize
    t = _tiled_bytes((bb, H, W + 2, Cin), mm)            # xw
    t += _tiled_bytes((bb, H, W, 3 * Cin), mm)           # xcat
    t += _tiled_bytes((bb, H + 2, W, 3 * Cin), mm)       # xp
    t += 2 * _tiled_bytes((bb * H * W, Cout), 4)         # f32 result + ReLU/copy
    return t


def _conv1_vmem_bytes(bb, H, W, Cin, Cout):
    mm = jnp.dtype(MATMUL_DTYPE).itemsize
    b = 2 * _tiled_bytes((bb, H, W, Cin), 4)             # input block, double-buffered
    b += 2 * _tiled_bytes((bb, H, W, Cout), mm)          # output block, double-buffered
    b += 2 * (_tiled_bytes((3, 3 * Cin, Cout), mm) + _tiled_bytes((1, Cout), 4))
    b += _conv3x3_halo_bytes(bb, H, W, Cin, Cout)
    return b


def _fused_vmem_bytes(bb, H, W, c_in, hd, rh, emb):
    mm = jnp.dtype(MATMUL_DTYPE).itemsize
    b = 2 * _tiled_bytes((bb, H, W, c_in), mm)           # input block, double-buffered
    b += 2 * _tiled_bytes((bb, H, W, emb), 4)            # output block, double-buffered
    b += 2 * (_tiled_bytes((3, 3 * c_in, hd), mm) + _tiled_bytes((3, 3 * hd, hd), mm)
              + _tiled_bytes((3, 3 * hd, rh), mm) + _tiled_bytes((rh, hd), mm)
              + _tiled_bytes((hd, emb), mm)
              + 2 * _tiled_bytes((1, hd), 4) + _tiled_bytes((1, emb), 4))
    # Worst-case live set inside the body: halo temporaries of the widest conv
    # plus the f32 carried activation and the residual branch.
    b += _conv3x3_halo_bytes(bb, H, W, max(c_in, hd), hd)
    b += 3 * _tiled_bytes((bb * H * W, hd), 4)
    return b


def _pick_batch_block(B, vmem_bytes_fn, budget_bytes):
    """Largest divisor of B whose per-grid-step tiled-VMEM estimate fits the
    budget, capped at B//2 so the 'parallel' grid axis has >=2 steps (both
    TensorCores usable on v7x; the BlockSpec pipeline has work to overlap)."""
    cap = max(1, B // 2)
    best = 1
    for bb in range(1, cap + 1):
        if B % bb == 0 and vmem_bytes_fn(bb) <= budget_bytes:
            best = bb
    # NOTE: if even bb == 1 exceeds the budget (huge images), spatial tiling
    # would be the next fallback; not needed at these model sizes.
    return best


# ----------------------------------------------------------------------------
# pallas_call wrappers
# ----------------------------------------------------------------------------
def _call_conv_s2d_relu(x, w, b):
    B, H, W, Cin = x.shape
    Cout = w.shape[-1]
    bb = _pick_batch_block(B, lambda n: _conv1_vmem_bytes(n, H, W, Cin, Cout),
                           _vmem_limit_bytes() // 2)
    return pl.pallas_call(
        _conv_s2d_relu_kernel,
        out_shape=jax.ShapeDtypeStruct((B, H, W, Cout), MATMUL_DTYPE),
        grid_spec=pltpu.PrefetchScalarGridSpec(
            num_scalar_prefetch=0,
            grid=(B // bb,),
            in_specs=[
                pl.BlockSpec((bb, H, W, Cin), lambda i: (i, 0, 0, 0)),
                pl.BlockSpec((3, 3 * Cin, Cout), lambda i: (0, 0, 0)),
                pl.BlockSpec((1, Cout), lambda i: (0, 0)),
            ],
            out_specs=pl.BlockSpec((bb, H, W, Cout), lambda i: (i, 0, 0, 0)),
        ),
        compiler_params=_compiler_params(),
    )(x, w, b)


def _call_fused_tail(x, wc2, bc2, wc3, bc3, wr3, wr1, wpq, bpq, n_res_layers):
    B, H, W, c_in = x.shape
    hd = wc3.shape[-1]
    rh = wr3.shape[-1]
    emb = wpq.shape[-1]
    bb = _pick_batch_block(B, lambda n: _fused_vmem_bytes(n, H, W, c_in, hd, rh, emb),
                           _vmem_limit_bytes() // 2)
    kernel = functools.partial(_fused_tail_kernel, n_res_layers=n_res_layers)
    return pl.pallas_call(
        kernel,
        out_shape=jax.ShapeDtypeStruct((B, H, W, emb), jnp.float32),
        grid_spec=pltpu.PrefetchScalarGridSpec(
            num_scalar_prefetch=0,
            grid=(B // bb,),
            in_specs=[
                pl.BlockSpec((bb, H, W, c_in), lambda i: (i, 0, 0, 0)),
                pl.BlockSpec((3, 3 * c_in, hd), lambda i: (0, 0, 0)),
                pl.BlockSpec((1, hd), lambda i: (0, 0)),
                pl.BlockSpec((3, 3 * hd, hd), lambda i: (0, 0, 0)),
                pl.BlockSpec((1, hd), lambda i: (0, 0)),
                pl.BlockSpec((3, 3 * hd, rh), lambda i: (0, 0, 0)),
                pl.BlockSpec((rh, hd), lambda i: (0, 0)),
                pl.BlockSpec((hd, emb), lambda i: (0, 0)),
                pl.BlockSpec((1, emb), lambda i: (0, 0)),
            ],
            out_specs=pl.BlockSpec((bb, H, W, emb), lambda i: (i, 0, 0, 0)),
        ),
        compiler_params=_compiler_params(),
    )(x, wc2, bc2, wc3, bc3, wr3, wr1, wpq, bpq)


# ----------------------------------------------------------------------------
# Layout / weight helpers (one-time wrapper work, constant-folded under jit)
# ----------------------------------------------------------------------------
def _space_to_depth2(x):
    B, H, W, C = x.shape
    assert H % 2 == 0 and W % 2 == 0
    x = x.reshape(B, H // 2, 2, W // 2, 2, C)
    x = jnp.transpose(x, (0, 1, 3, 2, 4, 5))              # (B, H/2, W/2, py, px, C)
    return x.reshape(B, H // 2, W // 2, 4 * C)


def _k4s2p1_as_s2d_3x3(w_oihw):
    """Rewrite Conv2d(k=4, s=2, p=1) weights as a 3x3/s=1/p=1 conv over the
    space-to-depth(2) input.  Returns HWIO weights of shape (3, 3, 4*Cin, Cout)."""
    Cout, Cin, KH, KW = w_oihw.shape
    assert KH == 4 and KW == 4
    w4 = jnp.transpose(w_oihw, (2, 3, 1, 0))               # HWIO (4, 4, Cin, Cout)
    zero = jnp.zeros((Cin, Cout), w4.dtype)
    rows = []
    for di in range(3):
        cols = []
        for dj in range(3):
            taps = []
            for py in range(2):
                for px in range(2):
                    ky, kx = 2 * di + py - 1, 2 * dj + px - 1
                    taps.append(w4[ky, kx] if (0 <= ky < 4 and 0 <= kx < 4) else zero)
            # channel packing (py, px, c) matches _space_to_depth2
            cols.append(jnp.stack(taps, axis=0).reshape(4 * Cin, Cout))
        rows.append(jnp.stack(cols, axis=0))
    return jnp.stack(rows, axis=0)                          # (3, 3, 4*Cin, Cout)


def _pack_hwio(w_hwio):
    """(3, 3, Cin, Cout) -> (3, 3*Cin, Cout) in the conv kernel's (dy)(dx, cin) packing."""
    return w_hwio.reshape(3, w_hwio.shape[1] * w_hwio.shape[2],
                          w_hwio.shape[3]).astype(MATMUL_DTYPE)


# ----------------------------------------------------------------------------
# Encoder forward (Pallas)
# ----------------------------------------------------------------------------
def encoder_forward(x_nchw, params, n_res_layers):
    """Encoder.forward.  x_nchw: (B, 1, H, W) float32 -> (B, emb, H/4, W/4) float32."""
    x = jnp.transpose(x_nchw, (0, 2, 3, 1))                 # NCHW -> NHWC (once)

    # Stage 1: Conv2d(1, h/2, k=4, s=2, p=1) + ReLU   (space-to-depth + 3x3 conv)
    w1 = _pack_hwio(_k4s2p1_as_s2d_3x3(params["w_c1"]))
    b1 = params["b_c1"].reshape(1, -1).astype(jnp.float32)
    h1 = _call_conv_s2d_relu(_space_to_depth2(x), w1, b1)   # (B, H/2, W/2, h/2)

    # Stage 2 (ONE fused pallas_call): conv2 + ReLU, conv3, residual stack
    # (shared weights applied n_res_layers times), final ReLU + prequant 1x1.
    wc2 = _pack_hwio(_k4s2p1_as_s2d_3x3(params["w_c2"]))
    bc2 = params["b_c2"].reshape(1, -1).astype(jnp.float32)
    wc3 = _pack_hwio(jnp.transpose(params["w_c3"], (2, 3, 1, 0)))
    bc3 = params["b_c3"].reshape(1, -1).astype(jnp.float32)
    wr3 = _pack_hwio(jnp.transpose(params["w_r3"], (2, 3, 1, 0)))
    wr1 = jnp.transpose(params["w_r1"][:, :, 0, 0], (1, 0)).astype(MATMUL_DTYPE)
    wpq = jnp.transpose(params["w_pq"][:, :, 0, 0], (1, 0)).astype(MATMUL_DTYPE)
    bpq = params["b_pq"].reshape(1, -1).astype(jnp.float32)

    out = _call_fused_tail(_space_to_depth2(h1), wc2, bc2, wc3, bc3,
                           wr3, wr1, wpq, bpq, n_res_layers)   # (B, H/4, W/4, emb)

    return jnp.transpose(out, (0, 3, 1, 2))                 # NHWC -> NCHW (once)


# ----------------------------------------------------------------------------
# Plain-JAX reference mirroring the PyTorch module (NCHW)
# ----------------------------------------------------------------------------
def _conv_ref(x, w_oihw, b, stride, pad):
    y = lax.conv_general_dilated(
        x, w_oihw, window_strides=(stride, stride),
        padding=((pad, pad), (pad, pad)),
        dimension_numbers=("NCHW", "OIHW", "NCHW"))
    if b is not None:
        y = y + b.reshape(1, -1, 1, 1)
    return y


def _reference_encoder(x, params, n_res_layers):
    h = jax.nn.relu(_conv_ref(x, params["w_c1"], params["b_c1"], 2, 1))
    h = jax.nn.relu(_conv_ref(h, params["w_c2"], params["b_c2"], 2, 1))
    h = _conv_ref(h, params["w_c3"], params["b_c3"], 1, 1)
    for _ in range(n_res_layers):
        r = jax.nn.relu(h)
        r = _conv_ref(r, params["w_r3"], None, 1, 1)
        r = jax.nn.relu(r)
        r = _conv_ref(r, params["w_r1"], None, 1, 0)
        h = h + r
    h = jax.nn.relu(h)
    return _conv_ref(h, params["w_pq"], params["b_pq"], 1, 0)


if __name__ == "__main__":
    key = jax.random.PRNGKey(0)
    ks = jax.random.split(key, 11)

    B, H, W = 2, 16, 16
    h_dim, res_h_dim, n_res_layers, embedding_dim = 32, 16, 2, 8

    def winit(k, shape, fan_in):
        return jax.random.normal(k, shape, dtype=jnp.float32) * (1.0 / fan_in ** 0.5)

    params = {
        "w_c1": winit(ks[0], (h_dim // 2, 1, 4, 4), 1 * 16),
        "b_c1": winit(ks[1], (h_dim // 2,), 16),
        "w_c2": winit(ks[2], (h_dim, h_dim // 2, 4, 4), (h_dim // 2) * 16),
        "b_c2": winit(ks[3], (h_dim,), 16),
        "w_c3": winit(ks[4], (h_dim, h_dim, 3, 3), h_dim * 9),
        "b_c3": winit(ks[5], (h_dim,), 16),
        "w_r3": winit(ks[6], (res_h_dim, h_dim, 3, 3), h_dim * 9),
        "w_r1": winit(ks[7], (h_dim, res_h_dim, 1, 1), res_h_dim),
        "w_pq": winit(ks[8], (embedding_dim, h_dim, 1, 1), h_dim),
        "b_pq": winit(ks[9], (embedding_dim,), 16),
    }

    x = jax.random.normal(ks[10], (B, 1, H, W), dtype=jnp.float32)

    fwd = jax.jit(functools.partial(encoder_forward, n_res_layers=n_res_layers))
    out = jax.block_until_ready(fwd(x, params))
    ref = jax.block_until_ready(_reference_encoder(x, params, n_res_layers))

    assert out.shape == (B, embedding_dim, H // 4, W // 4), out.shape
    err = float(jnp.max(jnp.abs(out - ref)))
    scale = float(jnp.max(jnp.abs(ref)))
    # bf16 MXU operands (per the perf review) loosen the match against the f32
    # reference; accumulation / bias / ReLU / residual adds are still f32.
    tol = 1e-4 if MATMUL_DTYPE == jnp.float32 else 5e-2 * max(1.0, scale)
    assert err <= tol, (err, tol)
    print("KERNEL_OK")
</pallas_src>

<mosaic_0001>
module attributes {stable_mosaic.version = 11 : i64} {
  func.func @_conv_s2d_relu_kernel(%arg0: i32, %arg1: memref<1x8x8x4xf32, #tpu.memory_space<vmem>>, %arg2: memref<3x12x16xbf16, #tpu.memory_space<vmem>>, %arg3: memref<1x16xf32, #tpu.memory_space<vmem>>, %arg4: memref<1x8x8x16xbf16, #tpu.memory_space<vmem>>) attributes {dimension_semantics = [#tpu.dimension_semantics<parallel>], iteration_bounds = array<i64: 2>, scalar_prefetch = 0 : i64, scratch_operands = 0 : i64, tpu.core_type = #tpu.core_type<tc>, window_params = [{transform_indices = @transform_0, window_bounds = array<i64: 1, 8, 8, 4>}, {pipeline_mode = #tpu.pipeline_mode<synchronous>, transform_indices = @transform_1, window_bounds = array<i64: 3, 12, 16>}, {pipeline_mode = #tpu.pipeline_mode<synchronous>, transform_indices = @transform_2, window_bounds = array<i64: 1, 16>}, {transform_indices = @transform_3, window_bounds = array<i64: 1, 8, 8, 16>}]} {
    %c0 = arith.constant 0 : index
    %c0_0 = arith.constant 0 : index
    %c0_1 = arith.constant 0 : index
    %c0_2 = arith.constant 0 : index
    %0 = vector.load %arg1[%c0, %c0_0, %c0_1, %c0_2] : memref<1x8x8x4xf32, #tpu.memory_space<vmem>>, vector<1x8x8x4xf32>
    %1 = arith.truncf %0 : vector<1x8x8x4xf32> to vector<1x8x8x4xbf16>
    %c0_3 = arith.constant 0 : index
    %c0_4 = arith.constant 0 : index
    %2 = vector.load %arg3[%c0_3, %c0_4] : memref<1x16xf32, #tpu.memory_space<vmem>>, vector<1x16xf32>
    %cst = arith.constant 0.000000e+00 : bf16
    %3 = vector.broadcast %cst : bf16 to vector<1x8x1x4xbf16>
    %4 = tpu.concatenate %3, %1, %3 in 2 : vector<1x8x1x4xbf16>, vector<1x8x8x4xbf16>, vector<1x8x1x4xbf16> -> vector<1x8x10x4xbf16>
    %5 = vector.extract_strided_slice %4 {offsets = [0, 0, 0, 0], sizes = [1, 8, 8, 4], strides = [1, 1, 1, 1]} : vector<1x8x10x4xbf16> to vector<1x8x8x4xbf16>
    %6 = vector.extract_strided_slice %4 {offsets = [0, 0, 1, 0], sizes = [1, 8, 8, 4], strides = [1, 1, 1, 1]} : vector<1x8x10x4xbf16> to vector<1x8x8x4xbf16>
    %7 = vector.extract_strided_slice %4 {offsets = [0, 0, 2, 0], sizes = [1, 8, 8, 4], strides = [1, 1, 1, 1]} : vector<1x8x10x4xbf16> to vector<1x8x8x4xbf16>
    %8 = tpu.concatenate %5, %6, %7 in 3 : vector<1x8x8x4xbf16>, vector<1x8x8x4xbf16>, vector<1x8x8x4xbf16> -> vector<1x8x8x12xbf16>
    %cst_5 = arith.constant 0.000000e+00 : bf16
    %9 = vector.broadcast %cst_5 : bf16 to vector<1x1x8x12xbf16>
    %10 = tpu.concatenate %9, %8, %9 in 1 : vector<1x1x8x12xbf16>, vector<1x8x8x12xbf16>, vector<1x1x8x12xbf16> -> vector<1x10x8x12xbf16>
    %11 = vector.extract_strided_slice %10 {offsets = [0, 0, 0, 0], sizes = [1, 8, 8, 12], strides = [1, 1, 1, 1]} : vector<1x10x8x12xbf16> to vector<1x8x8x12xbf16>
    %12 = vector.shape_cast %11 : vector<1x8x8x12xbf16> to vector<64x12xbf16>
    %c0_6 = arith.constant 0 : index
    %c0_7 = arith.constant 0 : index
    %c0_8 = arith.constant 0 : index
    %13 = vector.load %arg2[%c0_6, %c0_7, %c0_8] : memref<3x12x16xbf16, #tpu.memory_space<vmem>>, vector<1x12x16xbf16>
    %14 = vector.shape_cast %13 : vector<1x12x16xbf16> to vector<12x16xbf16>
    %cst_9 = arith.constant dense<0.000000e+00> : vector<64x16xf32>
    %15 = tpu.matmul %12, %14, %cst_9 {dimension_numbers = #tpu.dot_dimension_numbers<[1], [0], [0], [1], [0, 0, 1, 1], [], []>} : vector<64x12xbf16>, vector<12x16xbf16>, vector<64x16xf32> -> vector<64x16xf32>
    %16 = vector.extract_strided_slice %10 {offsets = [0, 1, 0, 0], sizes = [1, 8, 8, 12], strides = [1, 1, 1, 1]} : vector<1x10x8x12xbf16> to vector<1x8x8x12xbf16>
    %17 = vector.shape_cast %16 : vector<1x8x8x12xbf16> to vector<64x12xbf16>
    %c1 = arith.constant 1 : index
    %c0_10 = arith.constant 0 : index
    %c0_11 = arith.constant 0 : index
    %18 = vector.load %arg2[%c1, %c0_10, %c0_11] : memref<3x12x16xbf16, #tpu.memory_space<vmem>>, vector<1x12x16xbf16>
    %19 = vector.shape_cast %18 : vector<1x12x16xbf16> to vector<12x16xbf16>
    %cst_12 = arith.constant dense<0.000000e+00> : vector<64x16xf32>
    %20 = tpu.matmul %17, %19, %cst_12 {dimension_numbers = #tpu.dot_dimension_numbers<[1], [0], [0], [1], [0, 0, 1, 1], [], []>} : vector<64x12xbf16>, vector<12x16xbf16>, vector<64x16xf32> -> vector<64x16xf32>
    %21 = arith.addf %15, %20 : vector<64x16xf32>
    %22 = vector.extract_strided_slice %10 {offsets = [0, 2, 0, 0], sizes = [1, 8, 8, 12], strides = [1, 1, 1, 1]} : vector<1x10x8x12xbf16> to vector<1x8x8x12xbf16>
    %23 = vector.shape_cast %22 : vector<1x8x8x12xbf16> to vector<64x12xbf16>
    %c2 = arith.constant 2 : index
    %c0_13 = arith.constant 0 : index
    %c0_14 = arith.constant 0 : index
    %24 = vector.load %arg2[%c2, %c0_13, %c0_14] : memref<3x12x16xbf16, #tpu.memory_space<vmem>>, vector<1x12x16xbf16>
    %25 = vector.shape_cast %24 : vector<1x12x16xbf16> to vector<12x16xbf16>
    %cst_15 = arith.constant dense<0.000000e+00> : vector<64x16xf32>
    %26 = tpu.matmul %23, %25, %cst_15 {dimension_numbers = #tpu.dot_dimension_numbers<[1], [0], [0], [1], [0, 0, 1, 1], [], []>} : vector<64x12xbf16>, vector<12x16xbf16>, vector<64x16xf32> -> vector<64x16xf32>
    %27 = arith.addf %21, %26 : vector<64x16xf32>
    %28 = vector.broadcast %2 : vector<1x16xf32> to vector<64x16xf32>
    %29 = arith.addf %27, %28 : vector<64x16xf32>
    %cst_16 = arith.constant 0.000000e+00 : f32
    %30 = vector.broadcast %cst_16 : f32 to vector<64x16xf32>
    %31 = arith.maximumf %29, %30 : vector<64x16xf32>
    %32 = vector.shape_cast %31 : vector<64x16xf32> to vector<1x8x8x16xf32>
    %33 = arith.truncf %32 : vector<1x8x8x16xf32> to vector<1x8x8x16xbf16>
    %c0_17 = arith.constant 0 : index
    %c0_18 = arith.constant 0 : index
    %c0_19 = arith.constant 0 : index
    %c0_20 = arith.constant 0 : index
    %34 = vector.load %arg4[%c0_17, %c0_18, %c0_19, %c0_20] : memref<1x8x8x16xbf16, #tpu.memory_space<vmem>>, vector<1x8x8x16xbf16>
    tpu.vector_store %arg4[%c0_17, %c0_18, %c0_19, %c0_20], %33 {strides = array<i32>} : memref<1x8x8x16xbf16, #tpu.memory_space<vmem>>, vector<1x8x8x16xbf16>,
    return
  }
  func.func @transform_0(%arg0: i32) -> (i32, i32, i32, i32) {
    %c0_i32 = arith.constant 0 : i32
    %c0_i32_0 = arith.constant 0 : i32
    %c0_i32_1 = arith.constant 0 : i32
    %c0_i32_2 = arith.constant 0 : i32
    return %arg0, %c0_i32, %c0_i32_0, %c0_i32_1 : i32, i32, i32, i32
  }
  func.func @transform_1(%arg0: i32) -> (i32, i32, i32) {
    %c0_i32 = arith.constant 0 : i32
    %c0_i32_0 = arith.constant 0 : i32
    %c0_i32_1 = arith.constant 0 : i32
    %c0_i32_2 = arith.constant 0 : i32
    return %c0_i32, %c0_i32_0, %c0_i32_1 : i32, i32, i32
  }
  func.func @transform_2(%arg0: i32) -> (i32, i32) {
    %c0_i32 = arith.constant 0 : i32
    %c0_i32_0 = arith.constant 0 : i32
    %c0_i32_1 = arith.constant 0 : i32
    return %c0_i32, %c0_i32_0 : i32, i32
  }
  func.func @transform_3(%arg0: i32) -> (i32, i32, i32, i32) {
    %c0_i32 = arith.constant 0 : i32
    %c0_i32_0 = arith.constant 0 : i32
    %c0_i32_1 = arith.constant 0 : i32
    %c0_i32_2 = arith.constant 0 : i32
    return %arg0, %c0_i32, %c0_i32_0, %c0_i32_1 : i32, i32, i32, i32
  }
}

module attributes {stable_mosaic.version = 11 : i64} {
  func.func @_fused_tail_kernel(%arg0: i32, %arg1: memref<1x4x4x64xbf16, #tpu.memory_space<vmem>>, %arg2: memref<3x192x32xbf16, #tpu.memory_space<vmem>>, %arg3: memref<1x32xf32, #tpu.memory_space<vmem>>, %arg4: memref<3x96x32xbf16, #tpu.memory_space<vmem>>, %arg5: memref<1x32xf32, #tpu.memory_space<vmem>>, %arg6: memref<3x96x16xbf16, #tpu.memory_space<vmem>>, %arg7: memref<16x32xbf16, #tpu.memory_space<vmem>>, %arg8: memref<32x8xbf16, #tpu.memory_space<vmem>>, %arg9: memref<1x8xf32, #tpu.memory_space<vmem>>, %arg10: memref<1x4x4x8xf32, #tpu.memory_space<vmem>>) attributes {dimension_semantics = [#tpu.dimension_semantics<parallel>], iteration_bounds = array<i64: 2>, scalar_prefetch = 0 : i64, scratch_operands = 0 : i64, tpu.core_type = #tpu.core_type<tc>, window_params = [{transform_indices = @transform_0, window_bounds = array<i64: 1, 4, 4, 64>}, {pipeline_mode = #tpu.pipeline_mode<synchronous>, transform_indices = @transform_1, window_bounds = array<i64: 3, 192, 32>}, {pipeline_mode = #tpu.pipeline_mode<synchronous>, transform_indices = @transform_2, window_bounds = array<i64: 1, 32>}, {pipeline_mode = #tpu.pipeline_mode<synchronous>, transform_indices = @transform_3, window_bounds = array<i64: 3, 96, 32>}, {pipeline_mode = #tpu.pipeline_mode<synchronous>, transform_indices = @transform_4, window_bounds = array<i64: 1, 32>}, {pipeline_mode = #tpu.pipeline_mode<synchronous>, transform_indices = @transform_5, window_bounds = array<i64: 3, 96, 16>}, {pipeline_mode = #tpu.pipeline_mode<synchronous>, transform_indices = @transform_6, window_bounds = array<i64: 16, 32>}, {pipeline_mode = #tpu.pipeline_mode<synchronous>, transform_indices = @transform_7, window_bounds = array<i64: 32, 8>}, {pipeline_mode = #tpu.pipeline_mode<synchronous>, transform_indices = @transform_8, window_bounds = array<i64: 1, 8>}, {transform_indices = @transform_9, window_bounds = array<i64: 1, 4, 4, 8>}]} {
    %c0 = arith.constant 0 : index
    %c0_0 = arith.constant 0 : index
    %c0_1 = arith.constant 0 : index
    %c0_2 = arith.constant 0 : index
    %0 = vector.load %arg1[%c0, %c0_0, %c0_1, %c0_2] : memref<1x4x4x64xbf16, #tpu.memory_space<vmem>>, vector<1x4x4x64xbf16>
    %c0_3 = arith.constant 0 : index
    %c0_4 = arith.constant 0 : index
    %1 = vector.load %arg3[%c0_3, %c0_4] : memref<1x32xf32, #tpu.memory_space<vmem>>, vector<1x32xf32>
    %cst = arith.constant 0.000000e+00 : bf16
    %2 = vector.broadcast %cst : bf16 to vector<1x4x1x64xbf16>
    %3 = tpu.concatenate %2, %0, %2 in 2 : vector<1x4x1x64xbf16>, vector<1x4x4x64xbf16>, vector<1x4x1x64xbf16> -> vector<1x4x6x64xbf16>
    %4 = vector.extract_strided_slice %3 {offsets = [0, 0, 0, 0], sizes = [1, 4, 4, 64], strides = [1, 1, 1, 1]} : vector<1x4x6x64xbf16> to vector<1x4x4x64xbf16>
    %5 = vector.extract_strided_slice %3 {offsets = [0, 0, 1, 0], sizes = [1, 4, 4, 64], strides = [1, 1, 1, 1]} : vector<1x4x6x64xbf16> to vector<1x4x4x64xbf16>
    %6 = vector.extract_strided_slice %3 {offsets = [0, 0, 2, 0], sizes = [1, 4, 4, 64], strides = [1, 1, 1, 1]} : vector<1x4x6x64xbf16> to vector<1x4x4x64xbf16>
    %7 = tpu.concatenate %4, %5, %6 in 3 : vector<1x4x4x64xbf16>, vector<1x4x4x64xbf16>, vector<1x4x4x64xbf16> -> vector<1x4x4x192xbf16>
    %cst_5 = arith.constant 0.000000e+00 : bf16
    %8 = vector.broadcast %cst_5 : bf16 to vector<1x1x4x192xbf16>
    %9 = tpu.concatenate %8, %7, %8 in 1 : vector<1x1x4x192xbf16>, vector<1x4x4x192xbf16>, vector<1x1x4x192xbf16> -> vector<1x6x4x192xbf16>
    %10 = vector.extract_strided_slice %9 {offsets = [0, 0, 0, 0], sizes = [1, 4, 4, 192], strides = [1, 1, 1, 1]} : vector<1x6x4x192xbf16> to vector<1x4x4x192xbf16>
    %11 = vector.shape_cast %10 : vector<1x4x4x192xbf16> to vector<16x192xbf16>
    %c0_6 = arith.constant 0 : index
    %c0_7 = arith.constant 0 : index
    %c0_8 = arith.constant 0 : index
    %12 = vector.load %arg2[%c0_6, %c0_7, %c0_8] : memref<3x192x32xbf16, #tpu.memory_space<vmem>>, vector<1x192x32xbf16>
    %13 = vector.shape_cast %12 : vector<1x192x32xbf16> to vector<192x32xbf16>
    %cst_9 = arith.constant dense<0.000000e+00> : vector<16x32xf32>
    %14 = tpu.matmul %11, %13, %cst_9 {dimension_numbers = #tpu.dot_dimension_numbers<[1], [0], [0], [1], [0, 0, 1, 1], [], []>} : vector<16x192xbf16>, vector<192x32xbf16>, vector<16x32xf32> -> vector<16x32xf32>
    %15 = vector.extract_strided_slice %9 {offsets = [0, 1, 0, 0], sizes = [1, 4, 4, 192], strides = [1, 1, 1, 1]} : vector<1x6x4x192xbf16> to vector<1x4x4x192xbf16>
    %16 = vector.shape_cast %15 : vector<1x4x4x192xbf16> to vector<16x192xbf16>
    %c1 = arith.constant 1 : index
    %c0_10 = arith.constant 0 : index
    %c0_11 = arith.constant 0 : index
    %17 = vector.load %arg2[%c1, %c0_10, %c0_11] : memref<3x192x32xbf16, #tpu.memory_space<vmem>>, vector<1x192x32xbf16>
    %18 = vector.shape_cast %17 : vector<1x192x32xbf16> to vector<192x32xbf16>
    %cst_12 = arith.constant dense<0.000000e+00> : vector<16x32xf32>
    %19 = tpu.matmul %16, %18, %cst_12 {dimension_numbers = #tpu.dot_dimension_numbers<[1], [0], [0], [1], [0, 0, 1, 1], [], []>} : vector<16x192xbf16>, vector<192x32xbf16>, vector<16x32xf32> -> vector<16x32xf32>
    %20 = arith.addf %14, %19 : vector<16x32xf32>
    %21 = vector.extract_strided_slice %9 {offsets = [0, 2, 0, 0], sizes = [1, 4, 4, 192], strides = [1, 1, 1, 1]} : vector<1x6x4x192xbf16> to vector<1x4x4x192xbf16>
    %22 = vector.shape_cast %21 : vector<1x4x4x192xbf16> to vector<16x192xbf16>
    %c2 = arith.constant 2 : index
    %c0_13 = arith.constant 0 : index
    %c0_14 = arith.constant 0 : index
    %23 = vector.load %arg2[%c2, %c0_13, %c0_14] : memref<3x192x32xbf16, #tpu.memory_space<vmem>>, vector<1x192x32xbf16>
    %24 = vector.shape_cast %23 : vector<1x192x32xbf16> to vector<192x32xbf16>
    %cst_15 = arith.constant dense<0.000000e+00> : vector<16x32xf32>
    %25 = tpu.matmul %22, %24, %cst_15 {dimension_numbers = #tpu.dot_dimension_numbers<[1], [0], [0], [1], [0, 0, 1, 1], [], []>} : vector<16x192xbf16>, vector<192x32xbf16>, vector<16x32xf32> -> vector<16x32xf32>
    %26 = arith.addf %20, %25 : vector<16x32xf32>
    %27 = vector.broadcast %1 : vector<1x32xf32> to vector<16x32xf32>
    %28 = arith.addf %26, %27 : vector<16x32xf32>
    %cst_16 = arith.constant 0.000000e+00 : f32
    %29 = vector.broadcast %cst_16 : f32 to vector<16x32xf32>
    %30 = arith.maximumf %28, %29 : vector<16x32xf32>
    %31 = arith.truncf %30 : vector<16x32xf32> to vector<16x32xbf16>
    %32 = vector.shape_cast %31 : vector<16x32xbf16> to vector<1x4x4x32xbf16>
    %c0_17 = arith.constant 0 : index
    %c0_18 = arith.constant 0 : index
    %33 = vector.load %arg5[%c0_17, %c0_18] : memref<1x32xf32, #tpu.memory_space<vmem>>, vector<1x32xf32>
    %cst_19 = arith.constant 0.000000e+00 : bf16
    %34 = vector.broadcast %cst_19 : bf16 to vector<1x4x1x32xbf16>
    %35 = tpu.concatenate %34, %32, %34 in 2 : vector<1x4x1x32xbf16>, vector<1x4x4x32xbf16>, vector<1x4x1x32xbf16> -> vector<1x4x6x32xbf16>
    %36 = vector.extract_strided_slice %35 {offsets = [0, 0, 0, 0], sizes = [1, 4, 4, 32], strides = [1, 1, 1, 1]} : vector<1x4x6x32xbf16> to vector<1x4x4x32xbf16>
    %37 = vector.extract_strided_slice %35 {offsets = [0, 0, 1, 0], sizes = [1, 4, 4, 32], strides = [1, 1, 1, 1]} : vector<1x4x6x32xbf16> to vector<1x4x4x32xbf16>
    %38 = vector.extract_strided_slice %35 {offsets = [0, 0, 2, 0], sizes = [1, 4, 4, 32], strides = [1, 1, 1, 1]} : vector<1x4x6x32xbf16> to vector<1x4x4x32xbf16>
    %39 = tpu.concatenate %36, %37, %38 in 3 : vector<1x4x4x32xbf16>, vector<1x4x4x32xbf16>, vector<1x4x4x32xbf16> -> vector<1x4x4x96xbf16>
    %cst_20 = arith.constant 0.000000e+00 : bf16
    %40 = vector.broadcast %cst_20 : bf16 to vector<1x1x4x96xbf16>
    %41 = tpu.concatenate %40, %39, %40 in 1 : vector<1x1x4x96xbf16>, vector<1x4x4x96xbf16>, vector<1x1x4x96xbf16> -> vector<1x6x4x96xbf16>
    %42 = vector.extract_strided_slice %41 {offsets = [0, 0, 0, 0], sizes = [1, 4, 4, 96], strides = [1, 1, 1, 1]} : vector<1x6x4x96xbf16> to vector<1x4x4x96xbf16>
    %43 = vector.shape_cast %42 : vector<1x4x4x96xbf16> to vector<16x96xbf16>
    %c0_21 = arith.constant 0 : index
    %c0_22 = arith.constant 0 : index
    %c0_23 = arith.constant 0 : index
    %44 = vector.load %arg4[%c0_21, %c0_22, %c0_23] : memref<3x96x32xbf16, #tpu.memory_space<vmem>>, vector<1x96x32xbf16>
    %45 = vector.shape_cast %44 : vector<1x96x32xbf16> to vector<96x32xbf16>
    %cst_24 = arith.constant dense<0.000000e+00> : vector<16x32xf32>
    %46 = tpu.matmul %43, %45, %cst_24 {dimension_numbers = #tpu.dot_dimension_numbers<[1], [0], [0], [1], [0, 0, 1, 1], [], []>} : vector<16x96xbf16>, vector<96x32xbf16>, vector<16x32xf32> -> vector<16x32xf32>
    %47 = vector.extract_strided_slice %41 {offsets = [0, 1, 0, 0], sizes = [1, 4, 4, 96], strides = [1, 1, 1, 1]} : vector<1x6x4x96xbf16> to vector<1x4x4x96xbf16>
    %48 = vector.shape_cast %47 : vector<1x4x4x96xbf16> to vector<16x96xbf16>
    %c1_25 = arith.constant 1 : index
    %c0_26 = arith.constant 0 : index
    %c0_27 = arith.constant 0 : index
    %49 = vector.load %arg4[%c1_25, %c0_26, %c0_27] : memref<3x96x32xbf16, #tpu.memory_space<vmem>>, vector<1x96x32xbf16>
    %50 = vector.shape_cast %49 : vector<1x96x32xbf16> to vector<96x32xbf16>
    %cst_28 = arith.constant dense<0.000000e+00> : vector<16x32xf32>
    %51 = tpu.matmul %48, %50, %cst_28 {dimension_numbers = #tpu.dot_dimension_numbers<[1], [0], [0], [1], [0, 0, 1, 1], [], []>} : vector<16x96xbf16>, vector<96x32xbf16>, vector<16x32xf32> -> vector<16x32xf32>
    %52 = arith.addf %46, %51 : vector<16x32xf32>
    %53 = vector.extract_strided_slice %41 {offsets = [0, 2, 0, 0], sizes = [1, 4, 4, 96], strides = [1, 1, 1, 1]} : vector<1x6x4x96xbf16> to vector<1x4x4x96xbf16>
    %54 = vector.shape_cast %53 : vector<1x4x4x96xbf16> to vector<16x96xbf16>
    %c2_29 = arith.constant 2 : index
    %c0_30 = arith.constant 0 : index
    %c0_31 = arith.constant 0 : index
    %55 = vector.load %arg4[%c2_29, %c0_30, %c0_31] : memref<3x96x32xbf16, #tpu.memory_space<vmem>>, vector<1x96x32xbf16>
    %56 = vector.shape_cast %55 : vector<1x96x32xbf16> to vector<96x32xbf16>
    %cst_32 = arith.constant dense<0.000000e+00> : vector<16x32xf32>
    %57 = tpu.matmul %54, %56, %cst_32 {dimension_numbers = #tpu.dot_dimension_numbers<[1], [0], [0], [1], [0, 0, 1, 1], [], []>} : vector<16x96xbf16>, vector<96x32xbf16>, vector<16x32xf32> -> vector<16x32xf32>
    %58 = arith.addf %52, %57 : vector<16x32xf32>
    %59 = vector.broadcast %33 : vector<1x32xf32> to vector<16x32xf32>
    %60 = arith.addf %58, %59 : vector<16x32xf32>
    %cst_33 = arith.constant 0.000000e+00 : f32
    %61 = vector.broadcast %cst_33 : f32 to vector<16x32xf32>
    %62 = arith.maximumf %60, %61 : vector<16x32xf32>
    %63 = arith.truncf %62 : vector<16x32xf32> to vector<16x32xbf16>
    %64 = vector.shape_cast %63 : vector<16x32xbf16> to vector<1x4x4x32xbf16>
    %cst_34 = arith.constant 0.000000e+00 : bf16
    %65 = vector.broadcast %cst_34 : bf16 to vector<1x4x1x32xbf16>
    %66 = tpu.concatenate %65, %64, %65 in 2 : vector<1x4x1x32xbf16>, vector<1x4x4x32xbf16>, vector<1x4x1x32xbf16> -> vector<1x4x6x32xbf16>
    %67 = vector.extract_strided_slice %66 {offsets = [0, 0, 0, 0], sizes = [1, 4, 4, 32], strides = [1, 1, 1, 1]} : vector<1x4x6x32xbf16> to vector<1x4x4x32xbf16>
    %68 = vector.extract_strided_slice %66 {offsets = [0, 0, 1, 0], sizes = [1, 4, 4, 32], strides = [1, 1, 1, 1]} : vector<1x4x6x32xbf16> to vector<1x4x4x32xbf16>
    %69 = vector.extract_strided_slice %66 {offsets = [0, 0, 2, 0], sizes = [1, 4, 4, 32], strides = [1, 1, 1, 1]} : vector<1x4x6x32xbf16> to vector<1x4x4x32xbf16>
    %70 = tpu.concatenate %67, %68, %69 in 3 : vector<1x4x4x32xbf16>, vector<1x4x4x32xbf16>, vector<1x4x4x32xbf16> -> vector<1x4x4x96xbf16>
    %cst_35 = arith.constant 0.000000e+00 : bf16
    %71 = vector.broadcast %cst_35 : bf16 to vector<1x1x4x96xbf16>
    %72 = tpu.concatenate %71, %70, %71 in 1 : vector<1x1x4x96xbf16>, vector<1x4x4x96xbf16>, vector<1x1x4x96xbf16> -> vector<1x6x4x96xbf16>
    %73 = vector.extract_strided_slice %72 {offsets = [0, 0, 0, 0], sizes = [1, 4, 4, 96], strides = [1, 1, 1, 1]} : vector<1x6x4x96xbf16> to vector<1x4x4x96xbf16>
    %74 = vector.shape_cast %73 : vector<1x4x4x96xbf16> to vector<16x96xbf16>
    %c0_36 = arith.constant 0 : index
    %c0_37 = arith.constant 0 : index
    %c0_38 = arith.constant 0 : index
    %75 = vector.load %arg6[%c0_36, %c0_37, %c0_38] : memref<3x96x16xbf16, #tpu.memory_space<vmem>>, vector<1x96x16xbf16>
    %76 = vector.shape_cast %75 : vector<1x96x16xbf16> to vector<96x16xbf16>
    %cst_39 = arith.constant dense<0.000000e+00> : vector<16x16xf32>
    %77 = tpu.matmul %74, %76, %cst_39 {dimension_numbers = #tpu.dot_dimension_numbers<[1], [0], [0], [1], [0, 0, 1, 1], [], []>} : vector<16x96xbf16>, vector<96x16xbf16>, vector<16x16xf32> -> vector<16x16xf32>
    %78 = vector.extract_strided_slice %72 {offsets = [0, 1, 0, 0], sizes = [1, 4, 4, 96], strides = [1, 1, 1, 1]} : vector<1x6x4x96xbf16> to vector<1x4x4x96xbf16>
    %79 = vector.shape_cast %78 : vector<1x4x4x96xbf16> to vector<16x96xbf16>
    %c1_40 = arith.constant 1 : index
    %c0_41 = arith.constant 0 : index
    %c0_42 = arith.constant 0 : index
    %80 = vector.load %arg6[%c1_40, %c0_41, %c0_42] : memref<3x96x16xbf16, #tpu.memory_space<vmem>>, vector<1x96x16xbf16>
    %81 = vector.shape_cast %80 : vector<1x96x16xbf16> to vector<96x16xbf16>
    %cst_43 = arith.constant dense<0.000000e+00> : vector<16x16xf32>
    %82 = tpu.matmul %79, %81, %cst_43 {dimension_numbers = #tpu.dot_dimension_numbers<[1], [0], [0], [1], [0, 0, 1, 1], [], []>} : vector<16x96xbf16>, vector<96x16xbf16>, vector<16x16xf32> -> vector<16x16xf32>
    %83 = arith.addf %77, %82 : vector<16x16xf32>
    %84 = vector.extract_strided_slice %72 {offsets = [0, 2, 0, 0], sizes = [1, 4, 4, 96], strides = [1, 1, 1, 1]} : vector<1x6x4x96xbf16> to vector<1x4x4x96xbf16>
    %85 = vector.shape_cast %84 : vector<1x4x4x96xbf16> to vector<16x96xbf16>
    %c2_44 = arith.constant 2 : index
    %c0_45 = arith.constant 0 : index
    %c0_46 = arith.constant 0 : index
    %86 = vector.load %arg6[%c2_44, %c0_45, %c0_46] : memref<3x96x16xbf16, #tpu.memory_space<vmem>>, vector<1x96x16xbf16>
    %87 = vector.shape_cast %86 : vector<1x96x16xbf16> to vector<96x16xbf16>
    %cst_47 = arith.constant dense<0.000000e+00> : vector<16x16xf32>
    %88 = tpu.matmul %85, %87, %cst_47 {dimension_numbers = #tpu.dot_dimension_numbers<[1], [0], [0], [1], [0, 0, 1, 1], [], []>} : vector<16x96xbf16>, vector<96x16xbf16>, vector<16x16xf32> -> vector<16x16xf32>
    %89 = arith.addf %83, %88 : vector<16x16xf32>
    %cst_48 = arith.constant 0.000000e+00 : f32
    %90 = vector.broadcast %cst_48 : f32 to vector<16x16xf32>
    %91 = arith.maximumf %89, %90 : vector<16x16xf32>
    %92 = arith.truncf %91 : vector<16x16xf32> to vector<16x16xbf16>
    %c0_49 = arith.constant 0 : index
    %c0_50 = arith.constant 0 : index
    %93 = vector.load %arg7[%c0_49, %c0_50] : memref<16x32xbf16, #tpu.memory_space<vmem>>, vector<16x32xbf16>
    %cst_51 = arith.constant dense<0.000000e+00> : vector<16x32xf32>
    %94 = tpu.matmul %92, %93, %cst_51 {dimension_numbers = #tpu.dot_dimension_numbers<[1], [0], [0], [1], [0, 0, 1, 1], [], []>} : vector<16x16xbf16>, vector<16x32xbf16>, vector<16x32xf32> -> vector<16x32xf32>
    %95 = arith.addf %60, %94 : vector<16x32xf32>
    %cst_52 = arith.constant 0.000000e+00 : f32
    %96 = vector.broadcast %cst_52 : f32 to vector<16x32xf32>
    %97 = arith.maximumf %95, %96 : vector<16x32xf32>
    %98 = arith.truncf %97 : vector<16x32xf32> to vector<16x32xbf16>
    %99 = vector.shape_cast %98 : vector<16x32xbf16> to vector<1x4x4x32xbf16>
    %cst_53 = arith.constant 0.000000e+00 : bf16
    %100 = vector.broadcast %cst_53 : bf16 to vector<1x4x1x32xbf16>
    %101 = tpu.concatenate %100, %99, %100 in 2 : vector<1x4x1x32xbf16>, vector<1x4x4x32xbf16>, vector<1x4x1x32xbf16> -> vector<1x4x6x32xbf16>
    %102 = vector.extract_strided_slice %101 {offsets = [0, 0, 0, 0], sizes = [1, 4, 4, 32], strides = [1, 1, 1, 1]} : vector<1x4x6x32xbf16> to vector<1x4x4x32xbf16>
    %103 = vector.extract_strided_slice %101 {offsets = [0, 0, 1, 0], sizes = [1, 4, 4, 32], strides = [1, 1, 1, 1]} : vector<1x4x6x32xbf16> to vector<1x4x4x32xbf16>
    %104 = vector.extract_strided_slice %101 {offsets = [0, 0, 2, 0], sizes = [1, 4, 4, 32], strides = [1, 1, 1, 1]} : vector<1x4x6x32xbf16> to vector<1x4x4x32xbf16>
    %105 = tpu.concatenate %102, %103, %104 in 3 : vector<1x4x4x32xbf16>, vector<1x4x4x32xbf16>, vector<1x4x4x32xbf16> -> vector<1x4x4x96xbf16>
    %cst_54 = arith.constant 0.000000e+00 : bf16
    %106 = vector.broadcast %cst_54 : bf16 to vector<1x1x4x96xbf16>
    %107 = tpu.concatenate %106, %105, %106 in 1 : vector<1x1x4x96xbf16>, vector<1x4x4x96xbf16>, vector<1x1x4x96xbf16> -> vector<1x6x4x96xbf16>
    %108 = vector.extract_strided_slice %107 {offsets = [0, 0, 0, 0], sizes = [1, 4, 4, 96], strides = [1, 1, 1, 1]} : vector<1x6x4x96xbf16> to vector<1x4x4x96xbf16>
    %109 = vector.shape_cast %108 : vector<1x4x4x96xbf16> to vector<16x96xbf16>
    %c0_55 = arith.constant 0 : index
    %c0_56 = arith.constant 0 : index
    %c0_57 = arith.constant 0 : index
    %110 = vector.load %arg6[%c0_55, %c0_56, %c0_57] : memref<3x96x16xbf16, #tpu.memory_space<vmem>>, vector<1x96x16xbf16>
    %111 = vector.shape_cast %110 : vector<1x96x16xbf16> to vector<96x16xbf16>
    %cst_58 = arith.constant dense<0.000000e+00> : vector<16x16xf32>
    %112 = tpu.matmul %109, %111, %cst_58 {dimension_numbers = #tpu.dot_dimension_numbers<[1], [0], [0], [1], [0, 0, 1, 1], [], []>} : vector<16x96xbf16>, vector<96x16xbf16>, vector<16x16xf32> -> vector<16x16xf32>
    %113 = vector.extract_strided_slice %107 {offsets = [0, 1, 0, 0], sizes = [1, 4, 4, 96], strides = [1, 1, 1, 1]} : vector<1x6x4x96xbf16> to vector<1x4x4x96xbf16>
    %114 = vector.shape_cast %113 : vector<1x4x4x96xbf16> to vector<16x96xbf16>
    %c1_59 = arith.constant 1 : index
    %c0_60 = arith.constant 0 : index
    %c0_61 = arith.constant 0 : index
    %115 = vector.load %arg6[%c1_59, %c0_60, %c0_61] : memref<3x96x16xbf16, #tpu.memory_space<vmem>>, vector<1x96x16xbf16>
    %116 = vector.shape_cast %115 : vector<1x96x16xbf16> to vector<96x16xbf16>
    %cst_62 = arith.constant dense<0.000000e+00> : vector<16x16xf32>
    %117 = tpu.matmul %114, %116, %cst_62 {dimension_numbers = #tpu.dot_dimension_numbers<[1], [0], [0], [1], [0, 0, 1, 1], [], []>} : vector<16x96xbf16>, vector<96x16xbf16>, vector<16x16xf32> -> vector<16x16xf32>
    %118 = arith.addf %112, %117 : vector<16x16xf32>
    %119 = vector.extract_strided_slice %107 {offsets = [0, 2, 0, 0], sizes = [1, 4, 4, 96], strides = [1, 1, 1, 1]} : vector<1x6x4x96xbf16> to vector<1x4x4x96xbf16>
    %120 = vector.shape_cast %119 : vector<1x4x4x96xbf16> to vector<16x96xbf16>
    %c2_63 = arith.constant 2 : index
    %c0_64 = arith.constant 0 : index
    %c0_65 = arith.constant 0 : index
    %121 = vector.load %arg6[%c2_63, %c0_64, %c0_65] : memref<3x96x16xbf16, #tpu.memory_space<vmem>>, vector<1x96x16xbf16>
    %122 = vector.shape_cast %121 : vector<1x96x16xbf16> to vector<96x16xbf16>
    %cst_66 = arith.constant dense<0.000000e+00> : vector<16x16xf32>
    %123 = tpu.matmul %120, %122, %cst_66 {dimension_numbers = #tpu.dot_dimension_numbers<[1], [0], [0], [1], [0, 0, 1, 1], [], []>} : vector<16x96xbf16>, vector<96x16xbf16>, vector<16x16xf32> -> vector<16x16xf32>
    %124 = arith.addf %118, %123 : vector<16x16xf32>
    %cst_67 = arith.constant 0.000000e+00 : f32
    %125 = vector.broadcast %cst_67 : f32 to vector<16x16xf32>
    %126 = arith.maximumf %124, %125 : vector<16x16xf32>
    %127 = arith.truncf %126 : vector<16x16xf32> to vector<16x16xbf16>
    %c0_68 = arith.constant 0 : index
    %c0_69 = arith.constant 0 : index
    %128 = vector.load %arg7[%c0_68, %c0_69] : memref<16x32xbf16, #tpu.memory_space<vmem>>, vector<16x32xbf16>
    %cst_70 = arith.constant dense<0.000000e+00> : vector<16x32xf32>
    %129 = tpu.matmul %127, %128, %cst_70 {dimension_numbers = #tpu.dot_dimension_numbers<[1], [0], [0], [1], [0, 0, 1, 1], [], []>} : vector<16x16xbf16>, vector<16x32xbf16>, vector<16x32xf32> -> vector<16x32xf32>
    %130 = arith.addf %95, %129 : vector<16x32xf32>
    %cst_71 = arith.constant 0.000000e+00 : f32
    %131 = vector.broadcast %cst_71 : f32 to vector<16x32xf32>
    %132 = arith.maximumf %130, %131 : vector<16x32xf32>
    %133 = arith.truncf %132 : vector<16x32xf32> to vector<16x32xbf16>
    %c0_72 = arith.constant 0 : index
    %c0_73 = arith.constant 0 : index
    %134 = vector.load %arg8[%c0_72, %c0_73] : memref<32x8xbf16, #tpu.memory_space<vmem>>, vector<32x8xbf16>
    %cst_74 = arith.constant dense<0.000000e+00> : vector<16x8xf32>
    %135 = tpu.matmul %133, %134, %cst_74 {dimension_numbers = #tpu.dot_dimension_numbers<[1], [0], [0], [1], [0, 0, 1, 1], [], []>} : vector<16x32xbf16>, vector<32x8xbf16>, vector<16x8xf32> -> vector<16x8xf32>
    %c0_75 = arith.constant 0 : index
    %c0_76 = arith.constant 0 : index
    %136 = vector.load %arg9[%c0_75, %c0_76] : memref<1x8xf32, #tpu.memory_space<vmem>>, vector<1x8xf32>
    %137 = vector.broadcast %136 : vector<1x8xf32> to vector<16x8xf32>
    %138 = arith.addf %135, %137 : vector<16x8xf32>
    %139 = vector.shape_cast %138 : vector<16x8xf32> to vector<1x4x4x8xf32>
    %c0_77 = arith.constant 0 : index
    %c0_78 = arith.constant 0 : index
    %c0_79 = arith.constant 0 : index
    %c0_80 = arith.constant 0 : index
    %140 = vector.load %arg10[%c0_77, %c0_78, %c0_79, %c0_80] : memref<1x4x4x8xf32, #tpu.memory_space<vmem>>, vector<1x4x4x8xf32>
    tpu.vector_store %arg10[%c0_77, %c0_78, %c0_79, %c0_80], %139 {strides = array<i32>} : memref<1x4x4x8xf32, #tpu.memory_space<vmem>>, vector<1x4x4x8xf32>,
    return
  }
  func.func @transform_0(%arg0: i32) -> (i32, i32, i32, i32) {
    %c0_i32 = arith.constant 0 : i32
    %c0_i32_0 = arith.constant 0 : i32
    %c0_i32_1 = arith.constant 0 : i32
    %c0_i32_2 = arith.constant 0 : i32
    return %arg0, %c0_i32, %c0_i32_0, %c0_i32_1 : i32, i32, i32, i32
  }
  func.func @transform_1(%arg0: i32) -> (i32, i32, i32) {
    %c0_i32 = arith.constant 0 : i32
    %c0_i32_0 = arith.constant 0 : i32
    %c0_i32_1 = arith.constant 0 : i32
    %c0_i32_2 = arith.constant 0 : i32
    return %c0_i32, %c0_i32_0, %c0_i32_1 : i32, i32, i32
  }
  func.func @transform_2(%arg0: i32) -> (i32, i32) {
    %c0_i32 = arith.constant 0 : i32
    %c0_i32_0 = arith.constant 0 : i32
    %c0_i32_1 = arith.constant 0 : i32
    return %c0_i32, %c0_i32_0 : i32, i32
  }
  func.func @transform_3(%arg0: i32) -> (i32, i32, i32) {
    %c0_i32 = arith.constant 0 : i32
    %c0_i32_0 = arith.constant 0 : i32
    %c0_i32_1 = arith.constant 0 : i32
    %c0_i32_2 = arith.constant 0 : i32
    return %c0_i32, %c0_i32_0, %c0_i32_1 : i32, i32, i32
  }
  func.func @transform_4(%arg0: i32) -> (i32, i32) {
    %c0_i32 = arith.constant 0 : i32
    %c0_i32_0 = arith.constant 0 : i32
    %c0_i32_1 = arith.constant 0 : i32
    return %c0_i32, %c0_i32_0 : i32, i32
  }
  func.func @transform_5(%arg0: i32) -> (i32, i32, i32) {
    %c0_i32 = arith.constant 0 : i32
    %c0_i32_0 = arith.constant 0 : i32
    %c0_i32_1 = arith.constant 0 : i32
    %c0_i32_2 = arith.constant 0 : i32
    return %c0_i32, %c0_i32_0, %c0_i32_1 : i32, i32, i32
  }
  func.func @transform_6(%arg0: i32) -> (i32, i32) {
    %c0_i32 = arith.constant 0 : i32
    %c0_i32_0 = arith.constant 0 : i32
    %c0_i32_1 = arith.constant 0 : i32
    return %c0_i32, %c0_i32_0 : i32, i32
  }
  func.func @transform_7(%arg0: i32) -> (i32, i32) {
    %c0_i32 = arith.constant 0 : i32
    %c0_i32_0 = arith.constant 0 : i32
    %c0_i32_1 = arith.constant 0 : i32
    return %c0_i32, %c0_i32_0 : i32, i32
  }
  func.func @transform_8(%arg0: i32) -> (i32, i32) {
    %c0_i32 = arith.constant 0 : i32
    %c0_i32_0 = arith.constant 0 : i32
    %c0_i32_1 = arith.constant 0 : i32
    return %c0_i32, %c0_i32_0 : i32, i32
  }
  func.func @transform_9(%arg0: i32) -> (i32, i32, i32, i32) {
    %c0_i32 = arith.constant 0 : i32
    %c0_i32_0 = arith.constant 0 : i32
    %c0_i32_1 = arith.constant 0 : i32
    %c0_i32_2 = arith.constant 0 : i32
    return %arg0, %c0_i32, %c0_i32_0, %c0_i32_1 : i32, i32, i32, i32
  }
}

</mosaic_0001>

<bundles_post_ra>
// kernel: encoder_forward.2
= control target key start
LH: loop header
LB: loop body
LE: loop exit
PB: predicated region body
PF: predicated region fallthrough
CT: control target
= control target key end

     0   :  { %s936_s12 = smov 0   ;;  %s1134_s0 = inlined_call_operand.vmem [shape: f32[2,8,8,4], index: 0, kind: input, shape index: {}]   ;;  %s1135_s1 = inlined_call_operand.vmem [shape: bf16[3,12,16], index: 1, kind: input, shape index: {}]   ;;  %s1136_s2 = inlined_call_operand.vmem [shape: f32[1,16], index: 2, kind: input, shape index: {}]   ;;  %s1137_s3 = inlined_call_operand.vmem [shape: bf16[2,8,8,16], index: 3, kind: output, shape index: {}]  }
   0x1 LB: > { %s798_s13 = sadd.s32 4294967295, %s911_s12   ;;  %p802_p0 = scmp.ge.s32.totalorder %s911_s12, 1  ;;  %s911_s12 = sphi %s936_s12, %s13_s12  }
   0x2   : > { %p137_p1 = scmp.lt.s32.totalorder %s911_s12, 3 }
   0x4   : > { %p138_p2 = pnand %p802_p0, %p137_p1 }
   0x5   : > { %p161_p3 = scmp.lt.s32.totalorder (!%p138_p2), %s798_s13, 1  ;;  %s913_s18 = smov (!%p138_p2), 8  }
   0x6   : > { %141 = sbr.rel (%p138_p2) target bundleno = 397 (0x18d), region = 32  ;;  %s914_s21 = smov (!%p138_p2), 4  }
   0xb   : > { %s1143_s13 = smov (!%p161_p3, %s798_s13), 1  ;;  %vm253_vm0 = vcmask 1040384   ;;  %vm254_vm1 = vsmask.f32 256  ;;  %vm264_vm2 = vcmask 1044480   ;;  %vm456_vm6 = vcmask 1045504  }
   0xc   : > { %s838_s14 = sshll.u32 %s1143_s13, 6  ;;  %vm265_vm3 = vsmask.f32 4352  ;;  %vm961_vm4 = vmand %vm253_vm0, %vm254_vm1  ;;  %vm379_vm7 = vcmask 31744   ;;  %vm396_vm8 = vcmask 64512   ;;  %vm443_vm9 = vcmask 97280  }
   0xd   : > { %s950_s17 = scalar_lea.vmem %s1134_s0, %s838_s14  ;;  %vm967_vm5 = vmand %vm264_vm2, %vm265_vm3  ;;  %s839_s28 = sshll.u32 %s1143_s13, 5  ;;  %vm734_vm10 = vcmask 125952  }
   0xe   : > { %v177_v0 = vld [vmem:[%s950_s17 + $0x28] sm:$0xff]  ;;  %v176_v1 = vld [vmem:[%s950_s17 + $0x20] sm:$0xff]  ;;  %v179_v2 = vld [vmem:[%s950_s17 + $0x38] sm:$0xff]  ;;  %s1113_s4 = scalar_lea.vmem %s1137_s3, %s839_s28 }
   0xf   : > { %v185_v3 = vpack.c.bf16 %v177_v0, %v177_v0  ;;  %v184_v4 = vpack.c.bf16 %v176_v1, %v176_v1  ;;  %v187_v5 = vpack.c.bf16 %v179_v2, %v179_v2  ;;  %v178_v6 = vld [vmem:[%s950_s17 + $0x30] sm:$0xff]  ;;  %v173_v7 = vld [vmem:[%s950_s17 + $0x8] sm:$0xff]  ;;  %v172_v8 = vld [vmem:[%s950_s17] sm:$0xff] }
  0x10   : > { %v186_v9 = vpack.c.bf16 %v178_v6, %v178_v6  ;;  %v181_v10 = vpack.c.bf16 %v173_v7, %v173_v7  ;;  %v180_v11 = vpack.c.bf16 %v172_v8, %v172_v8  ;;  %v175_v24 = vld [vmem:[%s950_s17 + $0x18] sm:$0xff]  ;;  %v174_v49 = vld [vmem:[%s950_s17 + $0x10] sm:$0xff] }
  0x11   : > { %v225_v12 = vshrl.u32 %v185_v3, 16  ;;  %v228_v13 = vshll.u32 %v185_v3, 16  ;;  %v218_v14 = vshrl.u32 %v184_v4, 16  ;;  %v221_v15 = vshll.u32 %v184_v4, 16 }
  0x12   : > { %v239_v16 = vshrl.u32 %v187_v5, 16  ;;  %v242_v17 = vshll.u32 %v187_v5, 16  ;;  %v232_v18 = vshrl.u32 %v186_v9, 16  ;;  %v235_v19 = vshll.u32 %v186_v9, 16 }
  0x13   : > { %v227_v20 = vrot.slane %v225_v12, 7  ;;  %v220_v21 = vrot.slane %v218_v14, 7  ;;  %v197_v22 = vshrl.u32 %v181_v10, 16  ;;  %v200_v23 = vshll.u32 %v181_v10, 16 }
  0x14   : > { %v241_v26 = vrot.slane %v239_v16, 7  ;;  %v234_v27 = vrot.slane %v232_v18, 7  ;;  %v190_v28 = vshrl.u32 %v180_v11, 16  ;;  %v193_v35 = vshll.u32 %v180_v11, 16 }
  0x15   : > { %v230_v29 = vor.u32 %v228_v13, %v227_v20  ;;  %v223_v31 = vor.u32 %v221_v15, %v220_v21  ;;  %v199_v32 = vrot.slane %v197_v22, 7  ;;  %v183_v36 = vpack.c.bf16 %v175_v24, %v175_v24  ;;  %v902_v15 = vld [vmem:[%s1135_s1 + $0x8] sm:$0x3f]  }
  0x16   : > { %v244_v33 = vor.u32 %v242_v17, %v241_v26  ;;  %v237_v34 = vor.u32 %v235_v19, %v234_v27  ;;  %v192_v40 = vrot.slane %v190_v28, 7  ;;  %v182_v61 = vpack.c.bf16 %v174_v49, %v174_v49  ;;  %888 = vmatprep.subr.msk.bf16.mxu1 %vm456_vm6, %v902_v15  ;;  %887 = vmatprep.subr.msk.bf16.mxu0 %vm456_vm6, %v902_v15 }
  0x17   : > { %v261_v37 = vsel %vm961_vm4, 0, %v230_v29  ;;  %v260_v38 = vsel %vm961_vm4, 0, %v223_v31  ;;  %v202_v39 = vor.u32 %v200_v23, %v199_v32  ;;  %v211_v53 = vshrl.u32 %v183_v36, 16 }
  0x18   : > { %v977_v41 = vsel %vm967_vm5, %v261_v37, 0  ;;  %v981_v42 = vsel %vm967_vm5, %v260_v38, 0  ;;  %v263_v43 = vsel %vm961_vm4, 0, %v244_v33  ;;  %v262_v44 = vsel %vm961_vm4, 0, %v237_v34 }
  0x19   : > { %v360_v45 = vrot.slane %v977_v41, 1  ;;  %v359_v46 = vrot.slane %v981_v42, 1  ;;  %v991_v47 = vsel %vm967_vm5, %v263_v43, 0  ;;  %v995_v48 = vsel %vm967_vm5, %v262_v44, 0  ;;  %v904_v44 = vld [vmem:[%s1135_s1 + $0x10] sm:$0x3f]  }
  0x1a   : > { %v362_v50 = vrot.slane %v991_v47, 1  ;;  %v318_v51 = vshrl.u32 %v995_v48, 16  ;;  %v320_v52 = vshll.u32 %v995_v48, 16  ;;  %v361_v54 = vrot.slane %v995_v48, 1 }
  0x1b   : > { %373 = vrot.lane.b32.xlu1 %v360_v45, %s913_s18  ;;  %371 = vrot.lane.b32.xlu0 %v359_v46, %s913_s18  ;;  %v304_v55 = vshrl.u32 %v981_v42, 16  ;;  %v306_v56 = vshll.u32 %v981_v42, 16  ;;  %v327_v57 = vshll.u32 %v991_v47, 16  ;;  %v313_v59 = vshll.u32 %v977_v41, 16 }
  0x1c   : > { %v322_v58 = vrot.slane %v320_v52, 1  ;;  %v257_v60 = vsel %vm961_vm4, 0, %v202_v39  ;;  %v325_v63 = vshrl.u32 %v991_v47, 16  ;;  %v195_v1 = vor.u32 %v193_v35, %v192_v40  ;;  %v903_v35 = vld [vmem:[%s1135_s1] sm:$0x3f]  }
  0x1d   : > { %v308_v62 = vrot.slane %v306_v56, 1  ;;  %v1013_v0 = vsel %vm967_vm5, %v257_v60, 0  ;;  %v329_v3 = vrot.slane %v327_v57, 1  ;;  %v311_v4 = vshrl.u32 %v977_v41, 16 }
  0x1e   : > { %v323_v2 = vor.u32 %v322_v58, %v318_v51  ;;  %v315_v5 = vrot.slane %v313_v59, 1  ;;  %v285_v7 = vshll.u32 %v1013_v0, 16  ;;  %v256_v8 = vsel %vm961_vm4, 0, %v195_v1 }
  0x1f   : > { %377 = vrot.lane.b32.xlu1 %v362_v50, %s913_s18  ;;  %375 = vrot.lane.b32.xlu0 %v361_v54, %s913_s18  ;;  %v309_v6 = vor.u32 %v308_v62, %v304_v55  ;;  %v213_v9 = vrot.slane %v211_v53, 7  ;;  %v1023_v10 = vsel %vm967_vm5, %v256_v8, 0  ;;  %v214_v11 = vshll.u32 %v183_v36, 16 }
  0x20   : > { %v278_v12 = vshll.u32 %v1023_v10, 16  ;;  %v204_v13 = vshrl.u32 %v182_v61, 16  ;;  %v207_v14 = vshll.u32 %v182_v61, 16  ;;  %v330_v16 = vor.u32 %v329_v3, %v325_v63 }
  0x21   : > { %v316_v17 = vor.u32 %v315_v5, %v311_v4  ;;  %v283_v18 = vshrl.u32 %v1013_v0, 16  ;;  %v216_v19 = vor.u32 %v214_v11, %v213_v9  ;;  %v287_v20 = vrot.slane %v285_v7, 1 }
  0x22   : > { %v276_v21 = vshrl.u32 %v1023_v10, 16  ;;  %v280_v22 = vrot.slane %v278_v12, 1  ;;  %v206_v23 = vrot.slane %v204_v13, 7  ;;  %v458_v28 = vsel %vm456_vm6, %v902_v15, 0 }
  0x23   : > { %343 = vrot.lane.b32.xlu1 %v323_v2, %s914_s21  ;;  %339 = vrot.lane.b32.xlu0 %v309_v6, %s914_s21  ;;  %v259_v24 = vsel %vm961_vm4, 0, %v216_v19  ;;  %v288_v31 = vor.u32 %v287_v20, %v283_v18  ;;  %v549_v40 = vsel %vm456_vm6, %v903_v35, 0  ;;  %v629_v30 = vsel %vm456_vm6, %v904_v44, 0 }
  0x24   : > { %v1037_v26 = vsel %vm967_vm5, %v259_v24, 0  ;;  %v209_v27 = vor.u32 %v207_v14, %v206_v23  ;;  %886 = vmatpush3.bf16.msra.mxu1 %v458_v28  ;;  %856 = vmatpush3.bf16.msra.mxu0 %v458_v28  ;;  %v281_v32 = vor.u32 %v280_v22, %v276_v21  ;;  %v356_v46 = vrot.slane %v1013_v0, 1 }
  0x25   : > { %v299_v29 = vshll.u32 %v1037_v26, 16  ;;  %v297_v33 = vshrl.u32 %v1037_v26, 16  ;;  %889 = vmatprep.subr.msk.bf16.mxu1 %vm456_vm6, %v903_v35  ;;  %890 = vmatprep.subr.msk.bf16.mxu0 %vm456_vm6, %v904_v44  ;;  %v355_v49 = vrot.slane %v1023_v10, 1  ;;  %v358_v50 = vrot.slane %v1037_v26, 1 }
  0x26   : > { %v258_v34 = vsel %vm961_vm4, 0, %v209_v27  ;;  %v915_v14 = vmov 0  }
  0x27   : > { %345 = vrot.lane.b32.xlu1 %v330_v16, %s914_s21  ;;  %341 = vrot.lane.b32.xlu0 %v316_v17, %s914_s21  ;;  %v301_v36 = vrot.slane %v299_v29, 1  ;;  %v269_v37 = vsel %vm967_vm5, %v258_v34, 0 }
  0x28   : > { %v290_v38 = vshrl.u32 %v269_v37, 16  ;;  %v292_v39 = vshll.u32 %v269_v37, 16  ;;  %v357_v51 = vrot.slane %v269_v37, 1 }
  0x29   : > { %v302_v25 = vor.u32 %v301_v36, %v297_v33 }
  0x2a   : > { %v294_v43 = vrot.slane %v292_v39, 1 }
  0x2b   : > { %333 = vrot.lane.b32.xlu1 %v288_v31, %s914_s21  ;;  %331 = vrot.lane.b32.xlu0 %v281_v32, %s914_s21 }
  0x2c   : > { %v295_v45 = vor.u32 %v294_v43, %v290_v38  ;;  %v835_v43 = vld [vmem:[%s1136_s2] ss:$0 sm:$0xff] }
  0x2f   : > { %337 = vrot.lane.b32.xlu1 %v302_v25, %s914_s21  ;;  %335 = vrot.lane.b32.xlu0 %v295_v45, %s914_s21 }
  0x33   : > { %365 = vrot.lane.b32.xlu1 %v356_v46, %s913_s18  ;;  %363 = vrot.lane.b32.xlu0 %v355_v49, %s913_s18 }
  0x37   : > { %369 = vrot.lane.b32.xlu1 %v358_v50, %s913_s18  ;;  %367 = vrot.lane.b32.xlu0 %v357_v51, %s913_s18 }
  0x8d   : > { %v374_v52 = vpop.permute.xlu1 %373  ;;  %v372_v53 = vpop.permute.xlu0 %371 }
  0x91   : > { %v378_v54 = vpop.permute.xlu1 %377  ;;  %v376_v55 = vpop.permute.xlu0 %375 }
  0x95   : > { %v344_v56 = vpop.permute.xlu1 %343  ;;  %v340_v57 = vpop.permute.xlu0 %339 }
  0x96   : > { %v393_v58 = vsel %vm379_vm7, %v995_v48, %v344_v56  ;;  %v389_v59 = vsel %vm379_vm7, %v981_v42, %v340_v57 }
  0x97   : > { %v410_v1 = vsel %vm396_vm8, %v393_v58, %v376_v55  ;;  %v406_v3 = vsel %vm396_vm8, %v389_v59, %v372_v53 }
  0x99   : > { %v346_v60 = vpop.permute.xlu1 %345  ;;  %v342_v61 = vpop.permute.xlu0 %341 }
  0x9a   : > { %v395_v62 = vsel %vm379_vm7, %v991_v47, %v346_v60  ;;  %v391_v63 = vsel %vm379_vm7, %v977_v41, %v342_v61 }
  0x9b   : > { %v412_v2 = vsel %vm396_vm8, %v395_v62, %v378_v54  ;;  %v408_v48 = vsel %vm396_vm8, %v391_v63, %v374_v52 }
  0x9c   : > { %v812_v4 = vcombine.low %v410_v1, %v412_v2  ;;  %v811_v5 = vcombine.low %v406_v3, %v408_v48  ;;  %v821_v24 = vcombine.low %v408_v48, %v410_v1 }
  0x9d   : > { %v334_v42 = vpop.permute.xlu1 %333  ;;  %v332_v6 = vpop.permute.xlu0 %331 }
  0x9e   : > { %861 = vmatprep.mubr.msk.bf16.mxu1 %vm443_vm9, %v811_v5  ;;  %v383_v7 = vsel %vm379_vm7, %v1013_v0, %v334_v42  ;;  %v381_v8 = vsel %vm379_vm7, %v1023_v10, %v332_v6 }
  0x9f   : > { %862 = vmatmul.mubr.msk.bf16.vlgmr.msra.gmra.mxu1 %vm443_vm9, %v812_v4 }
  0xa0   : > { %866 = vmatpush3.bf16.msra.mxu1 %v549_v40 }
  0xa1   : > { %v338_v47 = vpop.permute.xlu1 %337  ;;  %v336_v41 = vpop.permute.xlu0 %335 }
  0xa2   : > { %v387_v17 = vsel %vm379_vm7, %v1037_v26, %v338_v47  ;;  %v385_v18 = vsel %vm379_vm7, %v269_v37, %v336_v41  ;;  %v829_v26 = vcombine.low %v412_v2, %v915_v14 }
  0xa5   : > { %v366_v9 = vpop.permute.xlu1 %365  ;;  %v364_v11 = vpop.permute.xlu0 %363 }
  0xa6   : > { %v400_v12 = vsel %vm396_vm8, %v383_v7, %v366_v9  ;;  %v398_v13 = vsel %vm396_vm8, %v381_v8, %v364_v11 }
  0xa7   : > { %v818_v15 = vcombine.low %v915_v14, %v398_v13  ;;  %v809_v16 = vcombine.low %v398_v13, %v400_v12 }
  0xa9   : > { %v370_v19 = vpop.permute.xlu1 %369  ;;  %857 = vmatprep.mubr.msk.bf16.mxu0 %vm443_vm9, %v809_v16  ;;  %867 = vmatprep.mubr.msk.bf16.mxu1 %vm443_vm9, %v818_v15  ;;  %v368_v0 = vpop.permute.xlu0 %367 }
  0xaa   : > { %v404_v10 = vsel %vm396_vm8, %v387_v17, %v370_v19  ;;  %v402_v20 = vsel %vm396_vm8, %v385_v18, %v368_v0 }
  0xab   : > { %v820_v21 = vcombine.low %v404_v10, %v406_v3  ;;  %v810_v22 = vcombine.low %v402_v20, %v404_v10  ;;  %v819_v23 = vcombine.low %v400_v12, %v402_v20 }
  0xad   : > { %858 = vmatmul.mubr.msk.bf16.vlgmr.msra.gmra.mxu0 %vm443_vm9, %v810_v22  ;;  %868 = vmatmul.mubr.msk.bf16.vlgmr.msra.gmra.mxu1 %vm443_vm9, %v819_v23 }
  0xae   : > { %876 = vmatpush3.bf16.msra.mxu0 %v629_v30  ;;  %871 = vmatprep.mubr.msk.bf16.mxu1 %vm443_vm9, %v820_v21 }
  0xaf   : > { %877 = vmatprep.mubr.msk.bf16.mxu0 %vm443_vm9, %v819_v23 }
  0xb5   : > { %872 = vmatmul.mubr.msk.bf16.gmra.mxu1 %vm443_vm9, %v821_v24  ;;  %878 = vmatmul.mubr.msk.bf16.vlgmr.msra.gmra.mxu0 %vm443_vm9, %v820_v21 }
  0xb6   : > { %881 = vmatprep.mubr.msk.bf16.mxu0 %vm443_vm9, %v821_v24 }
  0xbd   : > { %882 = vmatmul.mubr.msk.bf16.gmra.mxu0 %vm443_vm9, %v829_v26 }
 0x15f   : > { %v863_v27 = vpop.f32.mrf.mxu1 }
 0x161   : > { %v510_v28 = vpop.f32.mrf.mxu1 }
 0x163   : > { %v864_v29 = vpop.f32.mrf.mxu1 }
 0x165   : > { %v513_v31 = vpop.f32.mrf.mxu1 }
 0x16d   : > { %v859_v32 = vpop.f32.mrf.mxu0  ;;  %v869_v33 = vpop.f32.mrf.mxu1 }
 0x16e   : > { %v594_v40 = vadd.f32 %v869_v33, %v859_v32 }
 0x16f   : > { %v494_v34 = vpop.f32.mrf.mxu0  ;;  %v585_v35 = vpop.f32.mrf.mxu1 }
 0x170   : > { %v586_v45 = vadd.f32 %v585_v35, %v494_v34 }
 0x171   : > { %v860_v36 = vpop.f32.mrf.mxu0  ;;  %v870_v37 = vpop.f32.mrf.mxu1 }
 0x172   : > { %v597_v50 = vadd.f32 %v870_v37, %v860_v36 }
 0x173   : > { %v497_v38 = vpop.f32.mrf.mxu0  ;;  %v588_v39 = vpop.f32.mrf.mxu1 }
 0x174   : > { %v589_v57 = vadd.f32 %v588_v39, %v497_v38 }
 0x175   : > { %v873_v25 = vpop.f32.mrf.mxu1  ;;  %v879_v44 = vpop.f32.mrf.mxu0 }
 0x176   : > { %v698_v30 = vadd.f32 %v879_v44, %v594_v40  ;;  %v610_v60 = vadd.f32 %v873_v25, %v863_v27 }
 0x177   : > { %v601_v46 = vpop.f32.mrf.mxu1  ;;  %v665_v49 = vpop.f32.mrf.mxu0 }
 0x178   : > { %v712_v51 = vadd.f32 %v835_v43, %v698_v30  ;;  %v696_v52 = vadd.f32 %v665_v49, %v586_v45  ;;  %v602_v3 = vadd.f32 %v601_v46, %v510_v28 }
 0x179   : > { %v880_v53 = vpop.f32.mrf.mxu0  ;;  %v874_v58 = vpop.f32.mrf.mxu1 }
 0x17a   : > { %v720_v54 = vmax.f32 %v712_v51, 0.0  ;;  %v710_v55 = vadd.f32 %v835_v43, %v696_v52  ;;  %v699_v56 = vadd.f32 %v880_v53, %v597_v50  ;;  %v613_v41 = vadd.f32 %v874_v58, %v864_v29 }
 0x17b   : > { %v668_v59 = vpop.f32.mrf.mxu0  ;;  %v604_v42 = vpop.f32.mrf.mxu1 }
 0x17c   : > { %v728_v61 = vpack.c.bf16 %v720_v54, %v720_v54  ;;  %v718_v62 = vmax.f32 %v710_v55, 0.0  ;;  %v713_v63 = vadd.f32 %v835_v43, %v699_v56  ;;  %v697_v1 = vadd.f32 %v668_v59, %v589_v57 }
 0x17d   : > { %v883_v2 = vpop.f32.mrf.mxu0  ;;  %v605_v13 = vadd.f32 %v604_v42, %v513_v31 }
 0x17e   : > { %737 = vst.msk [vmem:[%s1113_s4 + $0x8] sm:$0xf] %vm734_vm10, %v728_v61  ;;  %v726_v48 = vpack.c.bf16 %v718_v62, %v718_v62  ;;  %v721_v4 = vmax.f32 %v713_v63, 0.0  ;;  %v702_v5 = vadd.f32 %v883_v2, %v610_v60  ;;  %v711_v6 = vadd.f32 %v835_v43, %v697_v1 }
 0x17f   : > { %v681_v47 = vpop.f32.mrf.mxu0 }
 0x180   : > { %735 = vst.msk [vmem:[%s1113_s4] sm:$0xf] %vm734_vm10, %v726_v48  ;;  %v729_v7 = vpack.c.bf16 %v721_v4, %v721_v4  ;;  %v716_v8 = vadd.f32 %v835_v43, %v702_v5  ;;  %v700_v9 = vadd.f32 %v681_v47, %v602_v3  ;;  %v719_v11 = vmax.f32 %v711_v6, 0.0 }
 0x181   : > { %v884_v12 = vpop.f32.mrf.mxu0 }
 0x182   : > { %738 = vst.msk [vmem:[%s1113_s4 + $0xc] sm:$0xf] %vm734_vm10, %v729_v7  ;;  %v724_v14 = vmax.f32 %v716_v8, 0.0  ;;  %v714_v15 = vadd.f32 %v835_v43, %v700_v9  ;;  %v703_v16 = vadd.f32 %v884_v12, %v613_v41  ;;  %v727_v17 = vpack.c.bf16 %v719_v11, %v719_v11 }
 0x183   : > { %v684_v18 = vpop.f32.mrf.mxu0 }
 0x184   : > { %v732_v19 = vpack.c.bf16 %v724_v14, %v724_v14  ;;  %v722_v0 = vmax.f32 %v714_v15, 0.0  ;;  %v717_v10 = vadd.f32 %v835_v43, %v703_v16  ;;  %v701_v20 = vadd.f32 %v684_v18, %v605_v13  ;;  %736 = vst.msk [vmem:[%s1113_s4 + $0x4] sm:$0xf] %vm734_vm10, %v727_v17 }
 0x186   : > { %741 = vst.msk [vmem:[%s1113_s4 + $0x18] sm:$0xf] %vm734_vm10, %v732_v19  ;;  %v730_v21 = vpack.c.bf16 %v722_v0, %v722_v0  ;;  %v725_v22 = vmax.f32 %v717_v10, 0.0  ;;  %v715_v23 = vadd.f32 %v835_v43, %v701_v20 }
 0x188   : > { %739 = vst.msk [vmem:[%s1113_s4 + $0x10] sm:$0xf] %vm734_vm10, %v730_v21  ;;  %v733_v24 = vpack.c.bf16 %v725_v22, %v725_v22  ;;  %v723_v26 = vmax.f32 %v715_v23, 0.0 }
 0x18a   : > { %742 = vst.msk [vmem:[%s1113_s4 + $0x1c] sm:$0xf] %vm734_vm10, %v733_v24  ;;  %v731_v27 = vpack.c.bf16 %v723_v26, %v723_v26 }
 0x18c   : > { %740 = vst.msk [vmem:[%s1113_s4 + $0x14] sm:$0xf] %vm734_vm10, %v731_v27 }
 0x18d PF: > { %s13_s12 = sadd.s32 1, %s911_s12  }
 0x18e   : > { %p10_p4 = scmp.ge.s32.totalorder %s13_s12, 4  }
 0x190   :  { %12 = sbr.rel (!%p10_p4) target bundleno = 1 (0x1), region = 64 }

// kernel: encoder_forward.3
= control target key start
LH: loop header
LB: loop body
LE: loop exit
PB: predicated region body
PF: predicated region fallthrough
CT: control target
= control target key end

     0   :  { %14 = vsyncpa [#allocation3], 0  ;;  %s4048_s0 = inlined_call_operand.vmem [shape: bf16[2,4,4,64], index: 0, kind: input, shape index: {}]   ;;  %s4049_s1 = inlined_call_operand.vmem [shape: bf16[3,192,32], index: 1, kind: input, shape index: {}]   ;;  %s4050_s2 = inlined_call_operand.vmem [shape: f32[1,32], index: 2, kind: input, shape index: {}]   ;;  %s4051_s3 = inlined_call_operand.vmem [shape: bf16[3,96,32], index: 3, kind: input, shape index: {}]   ;;  %s4052_s4 = inlined_call_operand.vmem [shape: f32[1,32], index: 4, kind: input, shape index: {}]   ;;  %s4053_s5 = inlined_call_operand.vmem [shape: bf16[3,96,16], index: 5, kind: input, shape index: {}]   ;;  %s4054_s6 = inlined_call_operand.vmem [shape: bf16[16,32], index: 6, kind: input, shape index: {}]   ;;  %s4055_s7 = inlined_call_operand.vmem [shape: bf16[32,8], index: 7, kind: input, shape index: {}]   ;;  %s4056_s8 = inlined_call_operand.vmem [shape: f32[1,8], index: 8, kind: input, shape index: {}]   ;;  %s4057_s9 = inlined_call_operand.hbm [shape: f32[2,4,4,8], index: 9, kind: output, shape index: {}]  }
   0x1   :  { %16 = vsyncpa [#allocation3 + $0x1], 0  ;;  %s3260_s30 = smov 0   ;;  %s3262_s10 = smov 0  }
   0x2   :  { %s3264_s11 = smov 0   ;;  %s3266_s12 = smov 0  }
   0x3 LB: > { %s3281_s13 = sadd.s32 4294967295, %s3200_s12   ;;  %s2575_s14 = sadd.s32 4294967294, %s3200_s12   ;;  %s3200_s12 = sphi %s3266_s12, %s4067_s12   ;;  %s3196_s11 = sphi %s3264_s11, %s4066_s11   ;;  %s3192_s10 = sphi %s3262_s10, %s4065_s10   ;;  %s3188_s30 = sphi %s3260_s30, %s4064_s30  }
   0x4   : > { %s3285_s15 = sadd.s32 1, %s3200_s12   ;;  %s223_s16 = sadd.s32 1, %s3196_s11 }
   0x5   : > { %s220_s17 = ssub.s32 %s3200_s12, %s3285_s15  ;;  %p233_p0 = scmp.ne.s32.totalorder %s3196_s11, %s3192_s10 }
   0x6   : > { %p221_p1 = scmp.eq.s32.totalorder %s220_s17, 0  ;;  %p234_p2 = scmp.eq.s32.totalorder %s3281_s13, 1 }
   0x7   : > { %p239_p3 = scmp.ne.s32.totalorder %s3192_s10, %s3188_s30  ;;  %p240_p4 = scmp.eq.s32.totalorder %s2575_s14, 1 }
   0x8   : > { %s3296_s18 = scalar_select %p221_p1, %s3196_s11, %s223_s16  }
   0x9   : > { %p3298_p5 = por %p234_p2, %p233_p0  ;;  %p3302_p6 = por %p240_p4, %p239_p3 }
   0xa   : > { %p2578_p7 = scmp.ge.s32.totalorder %s3200_s12, 1  ;;  %p290_p8 = scmp.lt.s32.totalorder %s3200_s12, 3 }
   0xc   : > { %p291_p9 = pnand %p2578_p7, %p290_p8 }
   0xd   : > { %p326_p10 = scmp.lt.s32.totalorder (!%p291_p9), %s3281_s13, 1  ;;  %s3203_s24 = smov (!%p291_p9), 64  }
   0xe   : > { %294 = sbr.rel (%p291_p9) target bundleno = 2180 (0x884), region = 56  ;;  %s323_s14 = sand.u32 (!%p291_p9), 1, %s3192_s10  }
   0xf   : > { %s2579_s17 = sshll.u32 (!%p291_p9), %s323_s14, 4 }
  0x13   : > { %vm402_vm0 = vsmask.f32 256  ;;  %vm409_vm1 = vsmask.f32 2304  ;;  %v3065_v0 = vld [vmem:[%s4049_s1 + $0x98] sm:$0xff]   ;;  %s327_s23 = scalar_select %p326_p10, %s3281_s13, 1 }
  0x14   : > { %v3202_v1 = vmov 0   ;;  %vm401_vm2 = vcmask 1040384   ;;  %v3066_v2 = vld [vmem:[%s4049_s1 + $0x38] sm:$0xff]   ;;  %v3067_v3 = vld [vmem:[%s4049_s1 + $0x90] sm:$0xff]   ;;  %vm408_vm3 = vcmask 1042432   ;;  %v3069_v15 = vld [vmem:[%s4049_s1 + $0x88] sm:$0xff]  }
  0x15   : > { %656 = vmatprep.subr.bf16.mxu0 %v3202_v1  ;;  %791 = vmatprep.subr.bf16.mxu1 %v3202_v1  ;;  %s2783_s26 = sshll.u32 %s327_s23, 3  ;;  %v3068_v4 = vld [vmem:[%s4049_s1 + $0x30] sm:$0xff]   ;;  %vm3335_vm4 = vmand %vm401_vm2, %vm402_vm0  ;;  %v3070_v19 = vld [vmem:[%s4049_s1 + $0x28] sm:$0xff]   ;;  %vm459_vm6 = vcmask 523264   ;;  %vm3207_vm7 = vmmov 0   ;;  %vm1136_vm8 = vcmask 261120  }
  0x16   : > { %657 = vmatpush1.bf16.msra.mxu0 %v3065_v0  ;;  %s330_s16 = scalar_lea.vmem %s4048_s0, %s2783_s26  ;;  %792 = vmatpush1.bf16.msra.mxu1 %v3066_v2  ;;  %vm3345_vm5 = vmand %vm408_vm3, %vm409_vm1  ;;  %v3071_v25 = vld [vmem:[%s4049_s1 + $0x80] sm:$0xff]   ;;  %v3073_v31 = vld [vmem:[%s4049_s1 + $0x78] sm:$0xff]   ;;  %vm1235_vm9 = vcmask 785408   ;;  %vm1984_vm10 = vcmask 130048   ;;  %vm2494_vm11 = vcmask 60416   ;;  %s325_s23 = scalar_lea.vmem [#allocation2], %s2579_s17 }
  0x17   : > { %658 = vmatprep.subr.bf16.mxu0 %v3202_v1  ;;  %v2584_v5 = vld.sshfl [vmem:[%s330_s16 + $0x4] sm:$0x3 pattern:$0x76325410]  ;;  %793 = vmatprep.subr.bf16.mxu1 %v3202_v1  ;;  %v3074_v45 = vld [vmem:[%s4049_s1 + $0x18] sm:$0xff]   ;;  %v3075_v51 = vld [vmem:[%s4049_s1 + $0x70] sm:$0xff]  }
  0x18   : > { %v384_v6 = vshrl.u32 %v2584_v5, 16  ;;  %v387_v7 = vshll.u32 %v2584_v5, 16  ;;  %v2582_v8 = vld.sshfl [vmem:[%s330_s16] sm:$0x3 pattern:$0x76325410] }
  0x19   : > { %v370_v9 = vshrl.u32 %v2582_v8, 16  ;;  %v373_v10 = vshll.u32 %v2582_v8, 16  ;;  %v2585_v11 = vld.sshfl [vmem:[%s330_s16 + $0x6] sm:$0x3 pattern:$0x76325410] }
  0x1a   : > { %659 = vmatpush1.bf16.msra.mxu0 %v3067_v3  ;;  %v386_v12 = vrot.slane %v384_v6, 7  ;;  %v391_v13 = vshrl.u32 %v2585_v11, 16  ;;  %v394_v14 = vshll.u32 %v2585_v11, 16  ;;  %794 = vmatpush1.bf16.msra.mxu1 %v3068_v4  ;;  %v3072_v30 = vld [vmem:[%s4049_s1 + $0x20] sm:$0xff]   ;;  %v3076_v56 = vld [vmem:[%s4049_s1 + $0x10] sm:$0xff]   ;;  %v3077_v58 = vld [vmem:[%s4049_s1 + $0x68] sm:$0xff]  }
  0x1b   : > { %660 = vmatprep.subr.bf16.mxu0 %v3202_v1  ;;  %v372_v17 = vrot.slane %v370_v9, 7  ;;  %v2583_v18 = vld.sshfl [vmem:[%s330_s16 + $0x2] sm:$0x3 pattern:$0x76325410]  ;;  %795 = vmatprep.subr.bf16.mxu1 %v3202_v1  ;;  %v3078_v60 = vld [vmem:[%s4049_s1 + $0x8] sm:$0xff]  }
  0x1c   : > { %v389_v20 = vor.u32 %v387_v7, %v386_v12  ;;  %v393_v22 = vrot.slane %v391_v13, 7  ;;  %v377_v23 = vshrl.u32 %v2583_v18, 16  ;;  %v380_v24 = vshll.u32 %v2583_v18, 16  ;;  %v3079_v61 = vld [vmem:[%s4049_s1 + $0x60] sm:$0xff]   ;;  %v3081_v63 = vld [vmem:[%s4049_s1 + $0xb8] sm:$0xff]   ;;  %v3083_v2 = vld [vmem:[%s4049_s1 + $0xb0] sm:$0xff]  }
  0x1d   : > { %v375_v26 = vor.u32 %v373_v10, %v372_v17  ;;  %v3080_v62 = vld [vmem:[%s4049_s1] sm:$0xff]   ;;  %v3082_v0 = vld [vmem:[%s4049_s1 + $0x58] sm:$0xff]   ;;  %v3084_v3 = vld [vmem:[%s4049_s1 + $0x50] sm:$0xff]   ;;  %v3204_v8 = vmov 1983009808   ;;  %v476_v10 = vlaneseq  ;;  %s3206_s16 = smov 32  }
  0x1e   : > { %661 = vmatpush1.bf16.msra.mxu0 %v3069_v15  ;;  %v406_v27 = vsel %vm3335_vm4, 0, %v389_v20  ;;  %v396_v28 = vor.u32 %v394_v14, %v393_v22  ;;  %v379_v29 = vrot.slane %v377_v23, 7  ;;  %796 = vmatpush1.bf16.msra.mxu1 %v3070_v19  ;;  %v3085_v4 = vld [vmem:[%s4049_s1 + $0xa8] sm:$0xff]   ;;  %v3087_v6 = vld [vmem:[%s4049_s1 + $0xa0] sm:$0xff]   ;;  %v474_v9 = vunpack.c.l.s4 %v3204_v8  ;;  %s2513_s25 = sshll.u32 %s325_s23, 4  ;;  %s2784_s26 = sshll.u32 %s3281_s13, 8  ;;  %s3997_s25 = int_to_ptr.vmem [resolvable:$true] %s2513_s25 }
  0x1f   : > { %662 = vmatprep.subr.bf16.mxu0 %v3202_v1  ;;  %v3363_v32 = vsel %vm3345_vm5, %v406_v27, 0  ;;  %v404_v33 = vsel %vm3335_vm4, 0, %v375_v26  ;;  %797 = vmatprep.subr.bf16.mxu1 %v3202_v1  ;;  %v3086_v5 = vld [vmem:[%s4049_s1 + $0x48] sm:$0xff]   ;;  %v3088_v7 = vld [vmem:[%s4049_s1 + $0x40] sm:$0xff]   ;;  %v477_v12 = vshrl.u32 %v476_v10, 7  ;;  %v472_v20 = vcombine.low %v3202_v1, %v3202_v1  ;;  %s4003_s28 = scalar_lea.hbm %s4057_s9, %s2784_s26  ;;  %s4006_s13 = scalar_lea.sflag [#allocation3], %s323_s14 }
  0x20   : > { %v430_v34 = vshrl.u32 %v3363_v32, 16  ;;  %v432_v35 = vshll.u32 %v3363_v32, 16  ;;  %v3372_v36 = vsel %vm3345_vm5, %v404_v33, 0  ;;  %v407_v37 = vsel %vm3335_vm4, 0, %v396_v28  ;;  %s3140_s29 = scalar_lea.vmem %s3997_s25, 256  ;;  %s3208_s17 = smov [#allocation2]  }
  0x21   : > { %v416_v38 = vshrl.u32 %v3372_v36, 16  ;;  %v418_v39 = vshll.u32 %v3372_v36, 16  ;;  %v3380_v40 = vsel %vm3345_vm5, %v407_v37, 0  ;;  %v382_v41 = vor.u32 %v380_v24, %v379_v29  ;;  %p3141_p11 = scmp.ne.s32.totalorder %s3997_s25, %s3140_s29  ;;  %s3144_s21 = sshll.u32 %s3208_s17, 4  ;;  %s3145_s21 = int_to_ptr.vmem [resolvable:$false] %s3144_s21 }
  0x22   : > { %663 = vmatpush1.bf16.msra.mxu0 %v3071_v25  ;;  %v434_v42 = vrot.slane %v432_v35, 1  ;;  %v437_v43 = vshrl.u32 %v3380_v40, 16  ;;  %v439_v44 = vshll.u32 %v3380_v40, 16  ;;  %798 = vmatpush1.bf16.msra.mxu1 %v3072_v30  ;;  %v475_v11 = vunpack.c.0.s8 %v474_v9  ;;  %s3146_s22 = scalar_lea.vmem %s3145_s21, 512  ;;  %p3147_p0 = scmp.lt.s32.totalorder %s3997_s25, %s3145_s21 }
  0x23   : > { %664 = vmatprep.subr.bf16.mxu0 %v3202_v1  ;;  %v420_v46 = vrot.slane %v418_v39, 1  ;;  %v405_v47 = vsel %vm3335_vm4, 0, %v382_v41  ;;  %799 = vmatprep.subr.bf16.mxu1 %v3202_v1  ;;  %v455_v13 = vrot.slane %v3372_v36, 1  ;;  %v457_v14 = vrot.slane %v3363_v32, 1  ;;  %p3142_p12 = pnand %p3141_p11, %p3298_p5  ;;  %p3148_p1 = scmp.lt.s32.totalorder %s3146_s22, %s3140_s29 }
  0x24   : > { %v435_v48 = vor.u32 %v434_v42, %v430_v34  ;;  %v441_v49 = vrot.slane %v439_v44, 1  ;;  %v3393_v50 = vsel %vm3345_vm5, %v405_v47, 0  ;;  %v3460_v17 = vsub.s32 %v475_v11, %v477_v12 }
  0x25   : > { %v421_v52 = vor.u32 %v420_v46, %v416_v38  ;;  %v423_v53 = vshrl.u32 %v3393_v50, 16  ;;  %v425_v54 = vshll.u32 %v3393_v50, 16  ;;  %v458_v23 = vrot.slane %v3380_v40, 1  ;;  %p3143_p13 = pneg %p3142_p12  ;;  %p3149_p2 = por %p3148_p1, %p3147_p0 }
  0x26   : > { %665 = vmatpush1.bf16.msra.mxu0 %v3073_v31  ;;  %447 = vrot.lane.b32.xlu1 %v435_v48, %s3203_s24  ;;  %v442_v55 = vor.u32 %v441_v49, %v437_v43  ;;  %v456_v25 = vrot.slane %v3393_v50, 1  ;;  %v479_v29 = vrot.slane %v472_v20, %v3460_v17 }
  0x27   : > { %666 = vmatprep.subr.bf16.mxu0 %v3202_v1  ;;  %800 = vmatpush1.bf16.msra.mxu1 %v3074_v45  ;;  %v427_v57 = vrot.slane %v425_v54, 1  ;;  %v3090_v54 = vld [vmem:[%s4049_s1 + $0xf0] sm:$0xff]   ;;  %p3150_p3 = pnand %p3149_p2, %p3143_p13 }
  0x28   : > { %443 = vrot.lane.b32.xlu0 %v421_v52, %s3203_s24  ;;  %801 = vmatprep.subr.bf16.mxu1 %v3202_v1  ;;  %v3089_v52 = vld [vmem:[%s4049_s1 + $0xf8] sm:$0xff]  }
  0x29   : > { %v428_v59 = vor.u32 %v427_v57, %v423_v53  ;;  %v3093_v57 = vld [vmem:[%s4049_s1 + $0xd8] sm:$0xff]  }
  0x2a   : > { %667 = vmatpush1.bf16.msra.mxu0 %v3075_v51  ;;  %449 = vrot.lane.b32.xlu1 %v442_v55, %s3203_s24  ;;  %v3091_v55 = vld [vmem:[%s4049_s1 + $0xe8] sm:$0xff]  }
  0x2b   : > { %668 = vmatprep.subr.bf16.mxu0 %v3202_v1  ;;  %802 = vmatpush1.bf16.msra.mxu1 %v3076_v56  ;;  %v3092_v56 = vld [vmem:[%s4049_s1 + $0xe0] sm:$0xff]  }
  0x2c   : > { %445 = vrot.lane.b32.xlu0 %v428_v59, %s3203_s24  ;;  %803 = vmatprep.subr.bf16.mxu1 %v3202_v1  ;;  %v3095_v59 = vld [vmem:[%s4049_s1 + $0xc8] sm:$0xff]  }
  0x2e   : > { %669 = vmatpush1.bf16.msra.mxu0 %v3077_v58  ;;  %v3094_v58 = vld [vmem:[%s4049_s1 + $0xd0] sm:$0xff]  }
  0x2f   : > { %670 = vmatprep.subr.bf16.mxu0 %v3202_v1  ;;  %804 = vmatpush1.bf16.msra.mxu1 %v3078_v60  ;;  %v3096_v60 = vld [vmem:[%s4049_s1 + $0xc0] sm:$0xff]  }
  0x30   : > { %805 = vmatprep.subr.bf16.mxu1 %v3202_v1 }
  0x32   : > { %671 = vmatpush1.bf16.msra.mxu0 %v3079_v61  ;;  %v3097_v61 = vld [vmem:[%s4049_s1 + $0x118] sm:$0xff]  }
  0x33   : > { %680 = vmatprep.subr.bf16.mxu0 %v3202_v1  ;;  %806 = vmatpush1.bf16.msra.mxu1 %v3080_v62  ;;  %v3098_v62 = vld [vmem:[%s4049_s1 + $0x110] sm:$0xff]  }
  0x34   : > { %815 = vmatprep.subr.bf16.mxu1 %v3202_v1 }
  0x36   : > { %681 = vmatpush2.bf16.msra.mxu0 %v3081_v63  ;;  %v3099_v63 = vld [vmem:[%s4049_s1 + $0x108] sm:$0xff]  }
  0x37   : > { %682 = vmatprep.subr.bf16.mxu0 %v3202_v1  ;;  %816 = vmatpush2.bf16.msra.mxu1 %v3082_v0  ;;  %v3100_v0 = vld [vmem:[%s4049_s1 + $0x100] sm:$0xff]  }
  0x38   : > { %817 = vmatprep.subr.bf16.mxu1 %v3202_v1 }
  0x3a   : > { %683 = vmatpush2.bf16.msra.mxu0 %v3083_v2 }
  0x3b   : > { %684 = vmatprep.subr.bf16.mxu0 %v3202_v1  ;;  %818 = vmatpush2.bf16.msra.mxu1 %v3084_v3  ;;  %v3101_v3 = vld [vmem:[%s4051_s3 + $0x58] sm:$0xff]  }
  0x3c   : > { %819 = vmatprep.subr.bf16.mxu1 %v3202_v1 }
  0x3e   : > { %685 = vmatpush2.bf16.msra.mxu0 %v3085_v4  ;;  %v3102_v4 = vld [vmem:[%s4051_s3 + $0x88] sm:$0xff]  }
  0x3f   : > { %686 = vmatprep.subr.bf16.mxu0 %v3202_v1  ;;  %820 = vmatpush2.bf16.msra.mxu1 %v3086_v5  ;;  %v3205_v5 = vmov 0.0  }
  0x40   : > { %821 = vmatprep.subr.bf16.mxu1 %v3202_v1 }
  0x42   : > { %687 = vmatpush2.bf16.msra.mxu0 %v3087_v6 }
  0x43   : > { %943 = vmatprep.subr.bf16.mxu0 %v3202_v1  ;;  %822 = vmatpush2.bf16.msra.mxu1 %v3088_v7 }
  0x44   : > { %2855 = vmatprep.subr.bf16.mxu1 %v3205_v5 }
  0x98   : > { %v448_v15 = vpop.permute.xlu1 %447 }
  0x99   : > { %v465_v18 = vsel %vm459_vm6, %v3363_v32, %v448_v15 }
  0x9a   : > { %v444_v19 = vpop.permute.xlu0 %443  ;;  %v496_v26 = vcombine.low %v465_v18, %v457_v14 }
  0x9b   : > { %v461_v22 = vsel %vm459_vm6, %v3372_v36, %v444_v19  ;;  %v2673_v19 = vld [vmem:[%s4050_s2] ss:$0 sm:$0xff] }
  0x9c   : > { %v480_v24 = vcombine.low %v461_v22, %v455_v13  ;;  %v450_v27 = vpop.permute.xlu1 %449  ;;  %v503_v35 = vrot.slane %v496_v26, %v3460_v17 }
  0x9d   : > { %v467_v30 = vsel %vm459_vm6, %v3380_v40, %v450_v27 }
  0x9e   : > { %v487_v28 = vrot.slane %v480_v24, %v3460_v17  ;;  %v446_v31 = vpop.permute.xlu0 %445  ;;  %v529_v32 = vcombine.low %v467_v30, %v458_v23 }
  0x9f   : > { %v463_v33 = vsel %vm459_vm6, %v3393_v50, %v446_v31 }
  0xa0   : > { %v488_v34 = vcombine.low %v463_v33, %v456_v25  ;;  %v536_v36 = vrot.slane %v529_v32, %v3460_v17  ;;  %v697_v38 = vcombine.low %v479_v29, %v487_v28 }
  0xa2   : > { %v495_v37 = vrot.slane %v488_v34, %v3460_v17  ;;  %v857_v39 = vcombine.low %v536_v36, %v479_v29  ;;  %v563_v41 = vcombine.low %v503_v35, %v536_v36  ;;  %v705_v47 = vrot.slane %v697_v38, %v3460_v17  ;;  %v3103_v34 = vld [vmem:[%s4051_s3 + $0x50] sm:$0xff]  }
  0xa4   : > { %v698_v42 = vcombine.low %v495_v37, %v503_v35  ;;  %v562_v43 = vcombine.low %v487_v28, %v495_v37  ;;  %v577_v44 = vrot.slane %v563_v41, %v3460_v17  ;;  %v864_v40 = vrot.slane %v857_v39, %v3460_v17  ;;  %v3104_v39 = vld [vmem:[%s4051_s3 + $0x80] sm:$0xff]  }
  0xa6   : > { %v712_v45 = vrot.slane %v698_v42, %v3460_v17  ;;  %v570_v46 = vrot.slane %v562_v43, %v3460_v17 }
  0xa8   : > { %v579_v48 = vcombine.high %v570_v46, %v577_v44  ;;  %v714_v49 = vcombine.high %v705_v47, %v712_v45  ;;  %v578_v50 = vcombine.low %v570_v46, %v577_v44  ;;  %v713_v51 = vcombine.low %v705_v47, %v712_v45 }
  0xa9   : > { %v866_v53 = vcombine.high %v712_v45, %v864_v40  ;;  %v865_v2 = vcombine.low %v712_v45, %v864_v40 }
  0xaa   : > { %2622 = vmatprep.mubr.msk.bf16.mxu0 %vm459_vm6, %v579_v48  ;;  %2635 = vmatprep.mubr.msk.bf16.mxu1 %vm459_vm6, %v714_v49 }
  0xab   : > { %689 = vmatmul.mubr.bf16.vlgmr.msra.gmra.mxu0 %v578_v50  ;;  %824 = vmatmul.mubr.bf16.vlgmr.msra.gmra.mxu1 %v713_v51  ;;  %v3105_v51 = vld [vmem:[%s4051_s3 + $0x48] sm:$0xff]  }
  0xac   : > { %944 = vmatpush1.bf16.msra.mxu0 %v3089_v52  ;;  %2672 = vmatprep.mubr.msk.bf16.mxu0 %vm459_vm6, %v866_v53 }
  0xad   : > { %945 = vmatprep.subr.bf16.mxu0 %v3202_v1  ;;  %2856 = vmatpush3.bf16.msra.mxu1 %v3101_v3 }
  0xae   : > { %2857 = vmatprep.subr.bf16.mxu1 %v3205_v5  ;;  %2867 = vmatprep.mubr.msk.bf16.mxu1 %vm3207_vm7, %v3205_v5 }
  0xb0   : > { %946 = vmatpush1.bf16.msra.mxu0 %v3090_v54 }
  0xb1   : > { %947 = vmatprep.subr.bf16.mxu0 %v3202_v1  ;;  %2858 = vmatpush3.bf16.msra.mxu1 %v3103_v34 }
  0xb2   : > { %2859 = vmatprep.subr.bf16.mxu1 %v3205_v5 }
  0xb4   : > { %948 = vmatpush1.bf16.msra.mxu0 %v3091_v55 }
  0xb5   : > { %949 = vmatprep.subr.bf16.mxu0 %v3202_v1  ;;  %2860 = vmatpush3.bf16.msra.mxu1 %v3105_v51 }
  0xb6   : > { %2861 = vmatprep.subr.bf16.mxu1 %v3205_v5 }
  0xb8   : > { %950 = vmatpush1.bf16.msra.mxu0 %v3092_v56  ;;  %v3106_v56 = vld [vmem:[%s4051_s3 + $0x78] sm:$0xff]  }
  0xb9   : > { %951 = vmatprep.subr.bf16.mxu0 %v3202_v1 }
  0xbc   : > { %952 = vmatpush1.bf16.msra.mxu0 %v3093_v57 }
  0xbd   : > { %953 = vmatprep.subr.bf16.mxu0 %v3202_v1 }
  0xc0   : > { %954 = vmatpush1.bf16.msra.mxu0 %v3094_v58  ;;  %v3107_v58 = vld [vmem:[%s4051_s3 + $0x40] sm:$0xff]  }
  0xc1   : > { %955 = vmatprep.subr.bf16.mxu0 %v3202_v1  ;;  %2862 = vmatpush3.bf16.msra.mxu1 %v3107_v58 }
  0xc2   : > { %2863 = vmatprep.subr.bf16.mxu1 %v3205_v5 }
  0xc4   : > { %956 = vmatpush1.bf16.msra.mxu0 %v3095_v59 }
  0xc5   : > { %957 = vmatprep.subr.bf16.mxu0 %v3202_v1 }
  0xc8   : > { %958 = vmatpush1.bf16.msra.mxu0 %v3096_v60 }
  0xc9   : > { %967 = vmatprep.subr.bf16.mxu0 %v3202_v1 }
  0xcc   : > { %968 = vmatpush2.bf16.msra.mxu0 %v3097_v61 }
  0xcd   : > { %969 = vmatprep.subr.bf16.mxu0 %v3202_v1 }
  0xd0   : > { %970 = vmatpush2.bf16.msra.mxu0 %v3098_v62 }
  0xd1   : > { %971 = vmatprep.subr.bf16.mxu0 %v3202_v1 }
  0xd4   : > { %972 = vmatpush2.bf16.msra.mxu0 %v3099_v63 }
  0xd5   : > { %973 = vmatprep.subr.bf16.mxu0 %v3202_v1 }
  0xd8   : > { %974 = vmatpush2.bf16.msra.mxu0 %v3100_v0  ;;  %v3108_v0 = vld [vmem:[%s4051_s3 + $0x70] sm:$0xff]  }
  0xd9   : > { %2887 = vmatprep.subr.bf16.mxu0 %v3205_v5 }
  0xdb   : > { %976 = vmatmul.mubr.bf16.vlgmr.msra.gmra.mxu0 %v865_v2 }
  0xdc   : > { %2888 = vmatpush3.bf16.msra.mxu0 %v3102_v4  ;;  %2899 = vmatprep.mubr.msk.bf16.mxu0 %vm3207_vm7, %v3205_v5 }
  0xdd   : > { %2889 = vmatprep.subr.bf16.mxu0 %v3205_v5 }
  0xe0   : > { %2890 = vmatpush3.bf16.msra.mxu0 %v3104_v39 }
  0xe1   : > { %2891 = vmatprep.subr.bf16.mxu0 %v3205_v5 }
  0xe4   : > { %2892 = vmatpush3.bf16.msra.mxu0 %v3106_v56 }
  0xe5   : > { %2893 = vmatprep.subr.bf16.mxu0 %v3205_v5 }
  0xe8   : > { %2894 = vmatpush3.bf16.msra.mxu0 %v3108_v0  ;;  %v3116_v0 = vld [vmem:[%s4051_s3 + $0x10] sm:$0xff]  }
  0xe9   : > { %2895 = vmatprep.subr.bf16.mxu0 %v3205_v5 }
 0x16b   : > { %v690_v6 = vpop.f32.mrf.mxu0  ;;  %v825_v7 = vpop.f32.mrf.mxu1 }
 0x16c   : > { %v826_v14 = vadd.f32 %v825_v7, %v690_v6 }
 0x16d   : > { %v692_v8 = vpop.f32.mrf.mxu0  ;;  %v827_v9 = vpop.f32.mrf.mxu1 }
 0x16f   : > { %v693_v10 = vpop.f32.mrf.mxu0  ;;  %v828_v11 = vpop.f32.mrf.mxu1 }
 0x170   : > { %v829_v22 = vadd.f32 %v828_v11, %v693_v10 }
 0x171   : > { %v695_v12 = vpop.f32.mrf.mxu0  ;;  %v830_v13 = vpop.f32.mrf.mxu1 }
 0x19b   : > { %v977_v15 = vpop.f32.mrf.mxu0 }
 0x19c   : > { %v984_v18 = vadd.f32 %v977_v15, %v826_v14  ;;  %v3109_v15 = vld [vmem:[%s4051_s3 + $0x38] sm:$0xff]  }
 0x19d   : > { %v979_v20 = vpop.f32.mrf.mxu0  ;;  %2864 = vmatpush3.bf16.msra.mxu1 %v3109_v15 }
 0x19e   : > { %v992_v24 = vadd.f32 %v2673_v19, %v984_v18  ;;  %2865 = vmatprep.subr.bf16.mxu1 %v3205_v5 }
 0x19f   : > { %v980_v23 = vpop.f32.mrf.mxu0 }
 0x1a0   : > { %v985_v25 = vadd.f32 %v980_v23, %v829_v22  ;;  %v994_v28 = vmax.f32 %v992_v24, 0.0  ;;  %v3110_v23 = vld [vmem:[%s4051_s3 + $0x68] sm:$0xff]  }
 0x1a1   : > { %v982_v26 = vpop.f32.mrf.mxu0  ;;  %2896 = vmatpush3.bf16.msra.mxu0 %v3110_v23 }
 0x1a2   : > { %v993_v27 = vadd.f32 %v2673_v19, %v985_v25  ;;  %2897 = vmatprep.subr.bf16.mxu0 %v3205_v5 }
 0x1a4   : > { %v995_v29 = vmax.f32 %v993_v27, 0.0 }
 0x1a6   : > { %v996_v30 = vpack.c.bf16 %v995_v29, %v994_v28  ;;  %v2674_v31 = vpack.c.bf16 %v995_v29, %v995_v29  ;;  %v3111_v28 = vld [vmem:[%s4051_s3 + $0x30] sm:$0xff]  }
 0x1a7   : > { %2866 = vmatpush3.bf16.msra.mxu1 %v3111_v28 }
 0x1a8   : > { %v1005_v32 = vrot.slane %v996_v30, %v3460_v17  ;;  %v1012_v33 = vrot.slane %v2674_v31, %v3460_v17  ;;  %v3112_v31 = vld [vmem:[%s4051_s3 + $0x60] sm:$0xff]   ;;  %2871 = vmatprep.subr.bf16.mxu1 %v3205_v5 }
 0x1a9   : > { %2898 = vmatpush3.bf16.msra.mxu0 %v3112_v31 }
 0x1aa   : > { %v1013_v35 = vcombine.high %v1005_v32, %v1005_v32  ;;  %v1014_v36 = vcombine.high %v1012_v33, %v1012_v33  ;;  %v1022_v37 = vrot.slane %v1005_v32, %v3460_v17  ;;  %v1036_v38 = vrot.slane %v1012_v33, %v3460_v17  ;;  %2919 = vmatprep.subr.bf16.mxu0 %v3205_v5 }
 0x1ac   : > { %v1029_v41 = vrot.slane %v1013_v35, %v3460_v17  ;;  %v1043_v42 = vrot.slane %v1014_v36, %v3460_v17  ;;  %v1045_v43 = vshrl.u32 %v1022_v37, 16  ;;  %v1059_v44 = vshrl.u32 %v1036_v38, 16 }
 0x1ad   : > { %v1048_v45 = vshll.u32 %v1022_v37, 16  ;;  %v1062_v49 = vshll.u32 %v1036_v38, 16 }
 0x1ae   : > { %v1047_v40 = vrot.slane %v1045_v43, 7  ;;  %v1052_v46 = vshrl.u32 %v1029_v41, 16  ;;  %v1066_v47 = vshrl.u32 %v1043_v42, 16  ;;  %v1061_v48 = vrot.slane %v1059_v44, 7 }
 0x1af   : > { %v1069_v50 = vshll.u32 %v1043_v42, 16  ;;  %v1055_v55 = vshll.u32 %v1029_v41, 16 }
 0x1b0   : > { %v1068_v52 = vrot.slane %v1066_v47, 7  ;;  %v1050_v53 = vor.u32 %v1048_v45, %v1047_v40  ;;  %v1054_v54 = vrot.slane %v1052_v46, 7  ;;  %v1064_v57 = vor.u32 %v1062_v49, %v1061_v48 }
 0x1b2   : > { %v1076_v59 = vsel %vm3335_vm4, 0, %v1050_v53  ;;  %v1057_v60 = vor.u32 %v1055_v55, %v1054_v54  ;;  %v1071_v61 = vor.u32 %v1069_v50, %v1068_v52  ;;  %v1078_v63 = vsel %vm3335_vm4, 0, %v1064_v57 }
 0x1b3   : > { %v3575_v62 = vsel %vm3345_vm5, %v1076_v59, 0  ;;  %v1082_v7 = vsel %vm3345_vm5, %v1078_v63, 0  ;;  %v3113_v59 = vld [vmem:[%s4051_s3 + $0x28] sm:$0xff]   ;;  %v3115_v63 = vld [vmem:[%s4051_s3 + $0x18] sm:$0xff]  }
 0x1b4   : > { %v1124_v2 = vrot.slane %v3575_v62, 1  ;;  %v1077_v3 = vsel %vm3335_vm4, 0, %v1057_v60  ;;  %v1087_v4 = vshll.u32 %v3575_v62, 16  ;;  %v1079_v8 = vsel %vm3335_vm4, 0, %v1071_v61 }
 0x1b5   : > { %v1081_v6 = vsel %vm3345_vm5, %v1077_v3, 0  ;;  %v1085_v10 = vshrl.u32 %v3575_v62, 16  ;;  %v1101_v13 = vshll.u32 %v1082_v7, 16  ;;  %v1083_v14 = vsel %vm3345_vm5, %v1079_v8, 0  ;;  %v3678_v8 = vld [vmem:[%s4053_s5 + $0x28] sm:$0xff]  }
 0x1b6   : > { %1128 = vrot.lane.b32.xlu0 %v1124_v2, %s3203_s24  ;;  %v1125_v9 = vrot.slane %v1081_v6, 1  ;;  %v1089_v11 = vrot.slane %v1087_v4, 1  ;;  %v1094_v12 = vshll.u32 %v1081_v6, 16  ;;  %v1092_v19 = vshrl.u32 %v1081_v6, 16  ;;  %v3117_v2 = vld [vmem:[%s4051_s3 + $0x8] sm:$0xff]   ;;  %v3118_v4 = vld [vmem:[%s4051_s3] sm:$0xff]  }
 0x1b7   : > { %v1108_v22 = vshll.u32 %v1083_v14, 16  ;;  %v1103_v24 = vrot.slane %v1101_v13, 1  ;;  %v1099_v26 = vshrl.u32 %v1082_v7, 16  ;;  %v1106_v30 = vshrl.u32 %v1083_v14, 16 }
 0x1b8   : > { %1130 = vrot.lane.b32.xlu1 %v1125_v9, %s3203_s24  ;;  %v1090_v18 = vor.u32 %v1089_v11, %v1085_v10  ;;  %v1096_v20 = vrot.slane %v1094_v12, 1  ;;  %v1126_v33 = vrot.slane %v1082_v7, 1  ;;  %v1127_v34 = vrot.slane %v1083_v14, 1  ;;  %v3683_v9 = vld [vmem:[%s4053_s5 + $0x58] sm:$0xff]  }
 0x1b9   : > { %v1110_v27 = vrot.slane %v1108_v22, 1  ;;  %v1104_v29 = vor.u32 %v1103_v24, %v1099_v26 }
 0x1ba   : > { %1112 = vrot.lane.b32.xlu0 %v1090_v18, %s3206_s16  ;;  %v1097_v25 = vor.u32 %v1096_v20, %v1092_v19 }
 0x1bb   : > { %v1111_v32 = vor.u32 %v1110_v27, %v1106_v30 }
 0x1bc   : > { %1114 = vrot.lane.b32.xlu1 %v1097_v25, %s3206_s16  ;;  %v2720_v25 = vld [vmem:[%s4052_s4] ss:$0 sm:$0xff] }
 0x1be   : > { %1116 = vrot.lane.b32.xlu0 %v1104_v29, %s3206_s16 }
 0x1c0   : > { %1118 = vrot.lane.b32.xlu1 %v1111_v32, %s3206_s16 }
 0x1c2   : > { %1132 = vrot.lane.b32.xlu0 %v1126_v33, %s3203_s24 }
 0x1c4   : > { %1134 = vrot.lane.b32.xlu1 %v1127_v34, %s3203_s24 }
 0x228   : > { %v1129_v35 = vpop.permute.xlu0 %1128 }
 0x22a   : > { %v1131_v36 = vpop.permute.xlu1 %1130 }
 0x22c   : > { %v1113_v37 = vpop.permute.xlu0 %1112 }
 0x22d   : > { %v1138_v42 = vsel %vm1136_vm8, %v3575_v62, %v1113_v37  ;;  %v3114_v62 = vld [vmem:[%s4051_s3 + $0x20] sm:$0xff]  }
 0x22e   : > { %v1115_v38 = vpop.permute.xlu1 %1114  ;;  %v1146_v46 = vsel %vm459_vm6, %v1138_v42, %v1129_v35 }
 0x22f   : > { %v1140_v39 = vsel %vm1136_vm8, %v1081_v6, %v1115_v38  ;;  %v1280_v3 = vcombine.low %v3202_v1, %v1146_v46  ;;  %v3703_v38 = vld [vmem:[%s4053_s5 + $0x20] sm:$0xff]  }
 0x230   : > { %v1117_v41 = vpop.permute.xlu0 %1116  ;;  %v1148_v44 = vsel %vm459_vm6, %v1140_v39, %v1131_v36  ;;  %v3708_v39 = vld [vmem:[%s4053_s5 + $0x50] sm:$0xff]  }
 0x231   : > { %v1142_v40 = vsel %vm1136_vm8, %v1082_v7, %v1117_v41  ;;  %v1182_v49 = vcombine.low %v1146_v46, %v1148_v44  ;;  %v1288_v6 = vrot.slane %v1280_v3, %v3460_v17 }
 0x232   : > { %v1119_v43 = vpop.permute.xlu1 %1118 }
 0x233   : > { %v1144_v48 = vsel %vm1136_vm8, %v1083_v14, %v1119_v43  ;;  %v1190_v55 = vrot.slane %v1182_v49, %v3460_v17 }
 0x234   : > { %v1133_v45 = vpop.permute.xlu0 %1132 }
 0x235   : > { %v1150_v47 = vsel %vm459_vm6, %v1142_v40, %v1133_v45 }
 0x236   : > { %v1281_v50 = vcombine.low %v1148_v44, %v1150_v47  ;;  %v1135_v51 = vpop.permute.xlu1 %1134 }
 0x237   : > { %v1152_v52 = vsel %vm459_vm6, %v1144_v48, %v1135_v51 }
 0x238   : > { %v1183_v53 = vcombine.low %v1150_v47, %v1152_v52  ;;  %v1390_v54 = vcombine.low %v1152_v52, %v3202_v1  ;;  %v1295_v56 = vrot.slane %v1281_v50, %v3460_v17  ;;  %v3721_v52 = vld [vmem:[%s4053_s5 + $0x18] sm:$0xff]  }
 0x23a   : > { %v1197_v57 = vrot.slane %v1183_v53, %v3460_v17  ;;  %v1397_v58 = vrot.slane %v1390_v54, %v3460_v17  ;;  %v1296_v7 = vcombine.low %v1288_v6, %v1295_v56 }
 0x23c   : > { %v1198_v60 = vcombine.low %v1190_v55, %v1197_v57  ;;  %v1398_v61 = vcombine.low %v1295_v56, %v1397_v58  ;;  %v3726_v55 = vld [vmem:[%s4053_s5 + $0x48] sm:$0xff]  }
 0x23e   : > { %2868 = vmatmul.mubr.msk.bf16.vlgmr.msra.gmra.mxu1 %vm1235_vm9, %v1198_v60  ;;  %2900 = vmatmul.mubr.msk.bf16.vlgmr.msra.gmra.mxu0 %vm1235_vm9, %v1398_v61 }
 0x23f   : > { %2872 = vmatpush3.bf16.msra.mxu1 %v3113_v59  ;;  %2883 = vmatprep.mubr.msk.bf16.mxu1 %vm3207_vm7, %v3205_v5 }
 0x240   : > { %2873 = vmatprep.subr.bf16.mxu1 %v3205_v5  ;;  %2931 = vmatprep.mubr.msk.bf16.mxu0 %vm3207_vm7, %v3205_v5 }
 0x241   : > { %2920 = vmatpush3.bf16.msra.mxu0 %v3678_v8 }
 0x242   : > { %2921 = vmatprep.subr.bf16.mxu0 %v3205_v5 }
 0x243   : > { %2874 = vmatpush3.bf16.msra.mxu1 %v3114_v62 }
 0x244   : > { %2875 = vmatprep.subr.bf16.mxu1 %v3205_v5 }
 0x245   : > { %2922 = vmatpush3.bf16.msra.mxu0 %v3703_v38 }
 0x246   : > { %2923 = vmatprep.subr.bf16.mxu0 %v3205_v5 }
 0x247   : > { %2876 = vmatpush3.bf16.msra.mxu1 %v3115_v63 }
 0x248   : > { %2877 = vmatprep.subr.bf16.mxu1 %v3205_v5 }
 0x249   : > { %2924 = vmatpush3.bf16.msra.mxu0 %v3721_v52 }
 0x24a   : > { %2925 = vmatprep.subr.bf16.mxu0 %v3205_v5 }
 0x24b   : > { %2878 = vmatpush3.bf16.msra.mxu1 %v3116_v0  ;;  %v3737_v0 = vld [vmem:[%s4053_s5 + $0x10] sm:$0xff]  }
 0x24c   : > { %2879 = vmatprep.subr.bf16.mxu1 %v3205_v5 }
 0x24d   : > { %2926 = vmatpush3.bf16.msra.mxu0 %v3737_v0 }
 0x24e   : > { %2927 = vmatprep.subr.bf16.mxu0 %v3205_v5 }
 0x24f   : > { %2880 = vmatpush3.bf16.msra.mxu1 %v3117_v2  ;;  %v3742_v2 = vld [vmem:[%s4053_s5 + $0x40] sm:$0xff]  }
 0x250   : > { %2881 = vmatprep.subr.bf16.mxu1 %v3205_v5 }
 0x253   : > { %2882 = vmatpush3.bf16.msra.mxu1 %v3118_v4 }
 0x254   : > { %2903 = vmatprep.subr.bf16.mxu1 %v3205_v5 }
 0x256   : > { %2884 = vmatmul.mubr.msk.bf16.vlgmr.msra.gmra.mxu1 %vm1235_vm9, %v1296_v7 }
 0x257   : > { %2915 = vmatprep.mubr.msk.bf16.mxu1 %vm3207_vm7, %v3205_v5  ;;  %2904 = vmatpush3.bf16.msra.mxu1 %v3683_v9 }
 0x258   : > { %2905 = vmatprep.subr.bf16.mxu1 %v3205_v5 }
 0x25b   : > { %2906 = vmatpush3.bf16.msra.mxu1 %v3708_v39 }
 0x25c   : > { %2907 = vmatprep.subr.bf16.mxu1 %v3205_v5 }
 0x25f   : > { %2908 = vmatpush3.bf16.msra.mxu1 %v3726_v55 }
 0x260   : > { %2909 = vmatprep.subr.bf16.mxu1 %v3205_v5 }
 0x263   : > { %2910 = vmatpush3.bf16.msra.mxu1 %v3742_v2 }
 0x264   : > { %2911 = vmatprep.subr.bf16.mxu1 %v3205_v5 }
 0x2fe   : > { %v1273_v10 = vpop.f32.mrf.mxu1  ;;  %v1472_v11 = vpop.f32.mrf.mxu0 }
 0x300   : > { %v2869_v12 = vpop.f32.mrf.mxu1  ;;  %v2901_v13 = vpop.f32.mrf.mxu0 }
 0x302   : > { %v1276_v14 = vpop.f32.mrf.mxu1  ;;  %v1475_v15 = vpop.f32.mrf.mxu0 }
 0x304   : > { %v2870_v18 = vpop.f32.mrf.mxu1  ;;  %v2902_v19 = vpop.f32.mrf.mxu0 }
 0x305   : > { %v3764_v19 = vld [vmem:[%s4053_s5 + $0x8] sm:$0xff]  }
 0x306   : > { %2928 = vmatpush3.bf16.msra.mxu0 %v3764_v19 }
 0x307   : > { %2929 = vmatprep.subr.bf16.mxu0 %v3205_v5 }
 0x316   : > { %v1370_v20 = vpop.f32.mrf.mxu1 }
 0x317   : > { %v1371_v22 = vadd.f32 %v1370_v20, %v1273_v10 }
 0x318   : > { %v2885_v23 = vpop.f32.mrf.mxu1 }
 0x319   : > { %v1479_v24 = vadd.f32 %v1472_v11, %v1371_v22 }
 0x31a   : > { %v1373_v26 = vpop.f32.mrf.mxu1 }
 0x31b   : > { %v1374_v27 = vadd.f32 %v1373_v26, %v1276_v14  ;;  %v3692_v29 = vadd.f32 %v2720_v25, %v1479_v24  ;;  %v3772_v24 = vld [vmem:[%s4053_s5 + $0x38] sm:$0xff]  }
 0x31c   : > { %v2886_v28 = vpop.f32.mrf.mxu1  ;;  %2912 = vmatpush3.bf16.msra.mxu1 %v3772_v24 }
 0x31d   : > { %v1480_v30 = vadd.f32 %v1475_v15, %v1374_v27  ;;  %v1489_v32 = vmax.f32 %v3692_v29, 0.0  ;;  %2913 = vmatprep.subr.bf16.mxu1 %v3205_v5 }
 0x31f   : > { %v3694_v31 = vadd.f32 %v2720_v25, %v1480_v30 }
 0x321   : > { %v1490_v33 = vmax.f32 %v3694_v31, 0.0 }
 0x323   : > { %v1491_v34 = vpack.c.bf16 %v1490_v33, %v1489_v32  ;;  %v2721_v35 = vpack.c.bf16 %v1490_v33, %v1490_v33 }
 0x325   : > { %v1500_v36 = vrot.slane %v1491_v34, %v3460_v17  ;;  %v1507_v37 = vrot.slane %v2721_v35, %v3460_v17  ;;  %v3784_v34 = vld [vmem:[%s4053_s5] sm:$0xff]  }
 0x326   : > { %2930 = vmatpush3.bf16.msra.mxu0 %v3784_v34 }
 0x327   : > { %v1508_v41 = vcombine.high %v1500_v36, %v1500_v36  ;;  %v1509_v42 = vcombine.high %v1507_v37, %v1507_v37  ;;  %v1516_v43 = vrot.slane %v1500_v36, %v3460_v17  ;;  %v1530_v44 = vrot.slane %v1507_v37, %v3460_v17  ;;  %v3791_v37 = vld [vmem:[%s4053_s5 + $0x30] sm:$0xff]   ;;  %2951 = vmatprep.subr.bf16.mxu0 %v3205_v5 }
 0x328   : > { %2914 = vmatpush3.bf16.msra.mxu1 %v3791_v37 }
 0x329   : > { %v1523_v40 = vrot.slane %v1508_v41, %v3460_v17  ;;  %v1537_v45 = vrot.slane %v1509_v42, %v3460_v17  ;;  %v1553_v46 = vshrl.u32 %v1530_v44, 16  ;;  %v1539_v47 = vshrl.u32 %v1516_v43, 16  ;;  %2935 = vmatprep.subr.bf16.mxu1 %v3205_v5 }
 0x32a   : > { %v1556_v48 = vshll.u32 %v1530_v44, 16  ;;  %v1542_v54 = vshll.u32 %v1516_v43, 16 }
 0x32b   : > { %v1546_v49 = vshrl.u32 %v1523_v40, 16  ;;  %v1555_v50 = vrot.slane %v1553_v46, 7  ;;  %v1560_v51 = vshrl.u32 %v1537_v45, 16  ;;  %v1541_v53 = vrot.slane %v1539_v47, 7 }
 0x32c   : > { %v1549_v57 = vshll.u32 %v1523_v40, 16  ;;  %v1563_v61 = vshll.u32 %v1537_v45, 16 }
 0x32d   : > { %v1548_v56 = vrot.slane %v1546_v49, 7  ;;  %v1558_v58 = vor.u32 %v1556_v48, %v1555_v50  ;;  %v1562_v59 = vrot.slane %v1560_v51, 7  ;;  %v1544_v60 = vor.u32 %v1542_v54, %v1541_v53 }
 0x32f   : > { %v1551_v62 = vor.u32 %v1549_v57, %v1548_v56  ;;  %v1572_v63 = vsel %vm3335_vm4, 0, %v1558_v58  ;;  %v1570_v3 = vsel %vm3335_vm4, 0, %v1544_v60  ;;  %v1565_v6 = vor.u32 %v1563_v61, %v1562_v59 }
 0x330   : > { %v3748_v4 = vsel %vm3345_vm5, %v1572_v63, 0  ;;  %v1574_v7 = vsel %vm3345_vm5, %v1570_v3, 0 }
 0x331   : > { %v1571_v10 = vsel %vm3335_vm4, 0, %v1551_v62  ;;  %v1618_v11 = vrot.slane %v1574_v7, 1  ;;  %v1581_v13 = vshll.u32 %v1574_v7, 16  ;;  %v1595_v14 = vshll.u32 %v3748_v4, 16 }
 0x332   : > { %v1575_v12 = vsel %vm3345_vm5, %v1571_v10, 0  ;;  %v1579_v20 = vshrl.u32 %v1574_v7, 16  ;;  %v1573_v23 = vsel %vm3335_vm4, 0, %v1565_v6  ;;  %v1593_v35 = vshrl.u32 %v3748_v4, 16 }
 0x333   : > { %v1619_v15 = vrot.slane %v1575_v12, 1  ;;  %v1588_v18 = vshll.u32 %v1575_v12, 16  ;;  %1622 = vrot.lane.b32.xlu0 %v1618_v11, %s3203_s24  ;;  %v1583_v22 = vrot.slane %v1581_v13, 1  ;;  %v1586_v25 = vshrl.u32 %v1575_v12, 16 }
 0x334   : > { %v1577_v27 = vsel %vm3345_vm5, %v1573_v23, 0  ;;  %v1597_v30 = vrot.slane %v1595_v14, 1  ;;  %v1620_v44 = vrot.slane %v3748_v4, 1  ;;  %v3820_v14 = vld [vmem:[%s4053_s5 + $0x88] sm:$0xff]  }
 0x335   : > { %1624 = vrot.lane.b32.xlu1 %v1619_v15, %s3203_s24  ;;  %v1590_v26 = vrot.slane %v1588_v18, 1  ;;  %v1584_v28 = vor.u32 %v1583_v22, %v1579_v20  ;;  %v1602_v32 = vshll.u32 %v1577_v27, 16  ;;  %v1600_v41 = vshrl.u32 %v1577_v27, 16  ;;  %v3830_v18 = vld [vmem:[%s4053_s5 + $0x80] sm:$0xff]   ;;  %v3839_v20 = vld [vmem:[%s4053_s5 + $0x78] sm:$0xff]   ;;  %v3846_v22 = vld [vmem:[%s4053_s5 + $0x70] sm:$0xff]  }
 0x336   : > { %v1598_v42 = vor.u32 %v1597_v30, %v1593_v35  ;;  %v1621_v40 = vrot.slane %v1577_v27, 1  ;;  %v3853_v23 = vld [vmem:[%s4053_s5 + $0x68] sm:$0xff]  }
 0x337   : > { %v1591_v33 = vor.u32 %v1590_v26, %v1586_v25  ;;  %1606 = vrot.lane.b32.xlu0 %v1584_v28, %s3206_s16  ;;  %v1604_v36 = vrot.slane %v1602_v32, 1  ;;  %v3861_v26 = vld [vmem:[%s4053_s5 + $0x60] sm:$0xff]  }
 0x339   : > { %1608 = vrot.lane.b32.xlu1 %v1591_v33, %s3206_s16  ;;  %v1605_v43 = vor.u32 %v1604_v36, %v1600_v41 }
 0x33b   : > { %1610 = vrot.lane.b32.xlu0 %v1598_v42, %s3206_s16 }
 0x33d   : > { %1612 = vrot.lane.b32.xlu1 %v1605_v43, %s3206_s16 }
 0x33f   : > { %1626 = vrot.lane.b32.xlu0 %v1620_v44, %s3203_s24 }
 0x341   : > { %1628 = vrot.lane.b32.xlu1 %v1621_v40, %s3203_s24 }
 0x3a5   : > { %v1623_v45 = vpop.permute.xlu0 %1622 }
 0x3a7   : > { %v1625_v46 = vpop.permute.xlu1 %1624 }
 0x3a9   : > { %v1607_v47 = vpop.permute.xlu0 %1606 }
 0x3aa   : > { %v1631_v49 = vsel %vm1136_vm8, %v1574_v7, %v1607_v47 }
 0x3ab   : > { %v1609_v48 = vpop.permute.xlu1 %1608  ;;  %v1639_v53 = vsel %vm459_vm6, %v1631_v49, %v1623_v45 }
 0x3ac   : > { %v1633_v50 = vsel %vm1136_vm8, %v1575_v12, %v1609_v48  ;;  %v1772_v57 = vcombine.low %v3202_v1, %v1639_v53 }
 0x3ad   : > { %v1611_v51 = vpop.permute.xlu0 %1610  ;;  %v1641_v56 = vsel %vm459_vm6, %v1633_v50, %v1625_v46 }
 0x3ae   : > { %v1635_v58 = vsel %vm1136_vm8, %v3748_v4, %v1611_v51  ;;  %v1675_v62 = vcombine.low %v1639_v53, %v1641_v56  ;;  %v1780_v10 = vrot.slane %v1772_v57, %v3460_v17 }
 0x3af   : > { %v1613_v54 = vpop.permute.xlu1 %1612 }
 0x3b0   : > { %v1637_v60 = vsel %vm1136_vm8, %v1577_v27, %v1613_v54  ;;  %v1683_v12 = vrot.slane %v1675_v62, %v3460_v17 }
 0x3b1   : > { %v1627_v59 = vpop.permute.xlu0 %1626 }
 0x3b2   : > { %v1643_v61 = vsel %vm459_vm6, %v1635_v58, %v1627_v59 }
 0x3b3   : > { %v1629_v63 = vpop.permute.xlu1 %1628  ;;  %v1773_v3 = vcombine.low %v1641_v56, %v1643_v61 }
 0x3b4   : > { %v1645_v6 = vsel %vm459_vm6, %v1637_v60, %v1629_v63 }
 0x3b5   : > { %v1676_v7 = vcombine.low %v1643_v61, %v1645_v6  ;;  %v1787_v11 = vrot.slane %v1773_v3, %v3460_v17  ;;  %v1882_v25 = vcombine.low %v1645_v6, %v3202_v1 }
 0x3b7   : > { %v1690_v13 = vrot.slane %v1676_v7, %v3460_v17  ;;  %v1788_v4 = vcombine.low %v1780_v10, %v1787_v11  ;;  %v1889_v27 = vrot.slane %v1882_v25, %v3460_v17 }
 0x3b9   : > { %v1691_v15 = vcombine.low %v1683_v12, %v1690_v13  ;;  %2932 = vmatmul.mubr.msk.bf16.vlgmr.msra.gmra.mxu0 %vm1235_vm9, %v1788_v4  ;;  %v1890_v28 = vcombine.low %v1787_v11, %v1889_v27 }
 0x3ba   : > { %2953 = vmatprep.mubr.msk.bf16.mxu0 %vm3207_vm7, %v3205_v5 }
 0x3bb   : > { %2916 = vmatmul.mubr.msk.bf16.vlgmr.msra.gmra.mxu1 %vm1235_vm9, %v1691_v15 }
 0x3bc   : > { %2936 = vmatpush3.bf16.msra.mxu1 %v3820_v14  ;;  %2947 = vmatprep.mubr.msk.bf16.mxu1 %vm3207_vm7, %v3205_v5 }
 0x3bd   : > { %2937 = vmatprep.subr.bf16.mxu1 %v3205_v5 }
 0x3c0   : > { %2938 = vmatpush3.bf16.msra.mxu1 %v3830_v18 }
 0x3c1   : > { %2939 = vmatprep.subr.bf16.mxu1 %v3205_v5 }
 0x3c4   : > { %2940 = vmatpush3.bf16.msra.mxu1 %v3839_v20 }
 0x3c5   : > { %2941 = vmatprep.subr.bf16.mxu1 %v3205_v5 }
 0x3c8   : > { %2942 = vmatpush3.bf16.msra.mxu1 %v3846_v22 }
 0x3c9   : > { %2943 = vmatprep.subr.bf16.mxu1 %v3205_v5 }
 0x3cc   : > { %2944 = vmatpush3.bf16.msra.mxu1 %v3853_v23 }
 0x3cd   : > { %2945 = vmatprep.subr.bf16.mxu1 %v3205_v5 }
 0x3d0   : > { %2946 = vmatpush3.bf16.msra.mxu1 %v3861_v26 }
 0x3d1   : > { %2957 = vmatprep.subr.bf16.mxu1 %v3205_v5 }
 0x3d3   : > { %2948 = vmatmul.mubr.msk.bf16.vlgmr.msra.gmra.mxu1 %vm1235_vm9, %v1890_v28 }
 0x3d4   : > { %2958 = vmatpush3.bf16.msra.mxu1 %v3683_v9  ;;  %2969 = vmatprep.mubr.msk.bf16.mxu1 %vm3207_vm7, %v3205_v5  ;;  %v3885_v9 = vld [vmem:[%s4054_s6] sm:$0xff]  }
 0x3d5   : > { %2959 = vmatprep.subr.bf16.mxu1 %v3205_v5  ;;  %2952 = vmatpush3.bf16.msra.mxu0 %v3885_v9 }
 0x3d6   : > { %2973 = vmatprep.subr.bf16.mxu0 %v3205_v5 }
 0x3d8   : > { %2960 = vmatpush3.bf16.msra.mxu1 %v3708_v39 }
 0x3d9   : > { %2961 = vmatprep.subr.bf16.mxu1 %v3205_v5 }
 0x3dc   : > { %2962 = vmatpush3.bf16.msra.mxu1 %v3726_v55 }
 0x3dd   : > { %2963 = vmatprep.subr.bf16.mxu1 %v3205_v5 }
 0x3e0   : > { %2964 = vmatpush3.bf16.msra.mxu1 %v3742_v2 }
 0x3e1   : > { %2965 = vmatprep.subr.bf16.mxu1 %v3205_v5 }
 0x3e4   : > { %2966 = vmatpush3.bf16.msra.mxu1 %v3772_v24 }
 0x3e5   : > { %2967 = vmatprep.subr.bf16.mxu1 %v3205_v5 }
 0x3e8   : > { %2968 = vmatpush3.bf16.msra.mxu1 %v3791_v37 }
 0x3e9   : > { %2989 = vmatprep.subr.bf16.mxu1 %v3205_v5 }
 0x479   : > { %v1862_v39 = vpop.f32.mrf.mxu0 }
 0x47b   : > { %v1765_v55 = vpop.f32.mrf.mxu1  ;;  %v2933_v2 = vpop.f32.mrf.mxu0 }
 0x47c   : > { %v1863_v37 = vadd.f32 %v1862_v39, %v1765_v55 }
 0x47d   : > { %v2917_v30 = vpop.f32.mrf.mxu1  ;;  %v1865_v24 = vpop.f32.mrf.mxu0 }
 0x47f   : > { %v1768_v32 = vpop.f32.mrf.mxu1  ;;  %v2934_v33 = vpop.f32.mrf.mxu0 }
 0x480   : > { %v1866_v42 = vadd.f32 %v1865_v24, %v1768_v32 }
 0x481   : > { %v2918_v35 = vpop.f32.mrf.mxu1 }
 0x493   : > { %v1964_v36 = vpop.f32.mrf.mxu1 }
 0x494   : > { %v1971_v43 = vadd.f32 %v1964_v36, %v1863_v37 }
 0x495   : > { %v2949_v41 = vpop.f32.mrf.mxu1 }
 0x496   : > { %v1973_v46 = vmax.f32 %v1971_v43, 0.0 }
 0x497   : > { %v1967_v44 = vpop.f32.mrf.mxu1 }
 0x498   : > { %v1972_v40 = vadd.f32 %v1967_v44, %v1866_v42 }
 0x499   : > { %v2950_v45 = vpop.f32.mrf.mxu1 }
 0x49a   : > { %v1974_v47 = vmax.f32 %v1972_v40, 0.0 }
 0x49c   : > { %v1975_v48 = vpack.c.bf16 %v1974_v47, %v1973_v46 }
 0x49e   : > { %2954 = vmatmul.mubr.msk.bf16.vlgmr.msra.gmra.mxu0 %vm1984_vm10, %v1975_v48 }
 0x49f   : > { %2974 = vmatpush3.bf16.msra.mxu0 %v3678_v8  ;;  %2985 = vmatprep.mubr.msk.bf16.mxu0 %vm3207_vm7, %v3205_v5 }
 0x4a0   : > { %2975 = vmatprep.subr.bf16.mxu0 %v3205_v5 }
 0x4a3   : > { %2976 = vmatpush3.bf16.msra.mxu0 %v3703_v38 }
 0x4a4   : > { %2977 = vmatprep.subr.bf16.mxu0 %v3205_v5 }
 0x4a7   : > { %2978 = vmatpush3.bf16.msra.mxu0 %v3721_v52 }
 0x4a8   : > { %2979 = vmatprep.subr.bf16.mxu0 %v3205_v5 }
 0x4ab   : > { %2980 = vmatpush3.bf16.msra.mxu0 %v3737_v0 }
 0x4ac   : > { %2981 = vmatprep.subr.bf16.mxu0 %v3205_v5 }
 0x4af   : > { %2982 = vmatpush3.bf16.msra.mxu0 %v3764_v19 }
 0x4b0   : > { %2983 = vmatprep.subr.bf16.mxu0 %v3205_v5 }
 0x4b3   : > { %2984 = vmatpush3.bf16.msra.mxu0 %v3784_v34 }
 0x4b4   : > { %3005 = vmatprep.subr.bf16.mxu0 %v3205_v5 }
 0x55e   : > { %v2022_v8 = vpop.f32.mrf.mxu0 }
 0x55f   : > { %v3905_v49 = vadd.f32 %v2022_v8, %v3692_v29 }
 0x560   : > { %v2955_v38 = vpop.f32.mrf.mxu0 }
 0x561   : > { %v2031_v51 = vmax.f32 %v3905_v49, 0.0 }
 0x562   : > { %v2025_v52 = vpop.f32.mrf.mxu0 }
 0x563   : > { %v3908_v50 = vadd.f32 %v2025_v52, %v3694_v31 }
 0x564   : > { %v2956_v0 = vpop.f32.mrf.mxu0 }
 0x565   : > { %v2032_v19 = vmax.f32 %v3908_v50, 0.0 }
 0x567   : > { %v2033_v53 = vpack.c.bf16 %v2032_v19, %v2031_v51  ;;  %v2769_v54 = vpack.c.bf16 %v2032_v19, %v2032_v19 }
 0x569   : > { %v2042_v34 = vrot.slane %v2033_v53, %v3460_v17  ;;  %v2049_v56 = vrot.slane %v2769_v54, %v3460_v17 }
 0x56b   : > { %v2050_v57 = vcombine.high %v2042_v34, %v2042_v34  ;;  %v2051_v58 = vcombine.high %v2049_v56, %v2049_v56  ;;  %v2058_v29 = vrot.slane %v2042_v34, %v3460_v17  ;;  %v2072_v59 = vrot.slane %v2049_v56, %v3460_v17 }
 0x56d   : > { %v2065_v31 = vrot.slane %v2050_v57, %v3460_v17  ;;  %v2079_v60 = vrot.slane %v2051_v58, %v3460_v17  ;;  %v2081_v61 = vshrl.u32 %v2058_v29, 16  ;;  %v2095_v62 = vshrl.u32 %v2072_v59, 16 }
 0x56e   : > { %v2084_v3 = vshll.u32 %v2058_v29, 16  ;;  %v2098_v12 = vshll.u32 %v2072_v59, 16 }
 0x56f   : > { %v2083_v63 = vrot.slane %v2081_v61, 7  ;;  %v2088_v6 = vshrl.u32 %v2065_v31, 16  ;;  %v2102_v7 = vshrl.u32 %v2079_v60, 16  ;;  %v2091_v10 = vshll.u32 %v2065_v31, 16 }
 0x570   : > { %v2097_v11 = vrot.slane %v2095_v62, 7  ;;  %v2105_v4 = vshll.u32 %v2079_v60, 16 }
 0x571   : > { %v2104_v13 = vrot.slane %v2102_v7, 7  ;;  %v2086_v15 = vor.u32 %v2084_v3, %v2083_v63  ;;  %v2090_v25 = vrot.slane %v2088_v6, 7 }
 0x572   : > { %v2100_v27 = vor.u32 %v2098_v12, %v2097_v11 }
 0x573   : > { %v2112_v28 = vsel %vm3335_vm4, 0, %v2086_v15  ;;  %v2093_v39 = vor.u32 %v2091_v10, %v2090_v25  ;;  %v2107_v55 = vor.u32 %v2105_v4, %v2104_v13 }
 0x574   : > { %v2116_v2 = vsel %vm3345_vm5, %v2112_v28, 0  ;;  %v2114_v30 = vsel %vm3335_vm4, 0, %v2100_v27 }
 0x575   : > { %v2160_v24 = vrot.slane %v2116_v2, 1  ;;  %v2113_v32 = vsel %vm3335_vm4, 0, %v2093_v39  ;;  %v2123_v33 = vshll.u32 %v2116_v2, 16  ;;  %v2118_v36 = vsel %vm3345_vm5, %v2114_v30, 0 }
 0x576   : > { %v2117_v35 = vsel %vm3345_vm5, %v2113_v32, 0  ;;  %v2115_v37 = vsel %vm3335_vm4, 0, %v2107_v55  ;;  %v2121_v42 = vshrl.u32 %v2116_v2, 16  ;;  %v2137_v40 = vshll.u32 %v2118_v36, 16 }
 0x577   : > { %2164 = vrot.lane.b32.xlu0 %v2160_v24, %s3203_s24  ;;  %v2161_v41 = vrot.slane %v2117_v35, 1  ;;  %v2125_v43 = vrot.slane %v2123_v33, 1  ;;  %v2130_v44 = vshll.u32 %v2117_v35, 16  ;;  %v2119_v45 = vsel %vm3345_vm5, %v2115_v37, 0 }
 0x578   : > { %v2128_v47 = vshrl.u32 %v2117_v35, 16  ;;  %v2144_v8 = vshll.u32 %v2119_v45, 16  ;;  %v2139_v38 = vrot.slane %v2137_v40, 1  ;;  %v2135_v52 = vshrl.u32 %v2118_v36, 16 }
 0x579   : > { %2166 = vrot.lane.b32.xlu1 %v2161_v41, %s3203_s24  ;;  %v2126_v46 = vor.u32 %v2125_v43, %v2121_v42  ;;  %v2132_v48 = vrot.slane %v2130_v44, 1  ;;  %v2142_v19 = vshrl.u32 %v2119_v45, 16  ;;  %v2162_v53 = vrot.slane %v2118_v36, 1 }
 0x57a   : > { %v2146_v0 = vrot.slane %v2144_v8, 1  ;;  %v2140_v51 = vor.u32 %v2139_v38, %v2135_v52  ;;  %v2163_v54 = vrot.slane %v2119_v45, 1 }
 0x57b   : > { %2148 = vrot.lane.b32.xlu0 %v2126_v46, %s3206_s16  ;;  %v2133_v16 = vor.u32 %v2132_v48, %v2128_v47  ;;  %v3138_v46 = vld [vmem:[%s4055_s7 + $0x8] sm:$0xff]   ;;  %v3139_v47 = vld [vmem:[%s4055_s7] sm:$0xff]  }
 0x57c   : > { %v2147_v21 = vor.u32 %v2146_v0, %v2142_v19 }
 0x57d   : > { %2150 = vrot.lane.b32.xlu1 %v2133_v16, %s3206_s16 }
 0x57f   : > { %2152 = vrot.lane.b32.xlu0 %v2140_v51, %s3206_s16 }
 0x581   : > { %2154 = vrot.lane.b32.xlu1 %v2147_v21, %s3206_s16 }
 0x583   : > { %2168 = vrot.lane.b32.xlu0 %v2162_v53, %s3203_s24 }
 0x585   : > { %2170 = vrot.lane.b32.xlu1 %v2163_v54, %s3203_s24 }
 0x5e9   : > { %v2165_v34 = vpop.permute.xlu0 %2164 }
 0x5eb   : > { %v2167_v56 = vpop.permute.xlu1 %2166 }
 0x5ed   : > { %v2149_v57 = vpop.permute.xlu0 %2148 }
 0x5ee   : > { %v2173_v58 = vsel %vm1136_vm8, %v2116_v2, %v2149_v57 }
 0x5ef   : > { %v2151_v29 = vpop.permute.xlu1 %2150  ;;  %v2181_v60 = vsel %vm459_vm6, %v2173_v58, %v2165_v34 }
 0x5f0   : > { %v2175_v59 = vsel %vm1136_vm8, %v2117_v35, %v2151_v29  ;;  %v2253_v63 = vcombine.low %v3202_v1, %v2181_v60 }
 0x5f1   : > { %v2153_v31 = vpop.permute.xlu0 %2152  ;;  %v2183_v62 = vsel %vm459_vm6, %v2175_v59, %v2167_v56 }
 0x5f2   : > { %v2177_v3 = vsel %vm1136_vm8, %v2118_v36, %v2153_v31  ;;  %v2192_v11 = vcombine.low %v2181_v60, %v2183_v62  ;;  %v2261_v15 = vrot.slane %v2253_v63, %v3460_v17 }
 0x5f3   : > { %v2155_v61 = vpop.permute.xlu1 %2154 }
 0x5f4   : > { %v2179_v10 = vsel %vm1136_vm8, %v2119_v45, %v2155_v61  ;;  %v2200_v28 = vrot.slane %v2192_v11, %v3460_v17 }
 0x5f5   : > { %v2169_v6 = vpop.permute.xlu0 %2168 }
 0x5f6   : > { %v2185_v7 = vsel %vm459_vm6, %v2177_v3, %v2169_v6 }
 0x5f7   : > { %v2254_v12 = vcombine.low %v2183_v62, %v2185_v7  ;;  %v2171_v13 = vpop.permute.xlu1 %2170 }
 0x5f8   : > { %v2187_v4 = vsel %vm459_vm6, %v2179_v10, %v2171_v13 }
 0x5f9   : > { %v2268_v25 = vrot.slane %v2254_v12, %v3460_v17  ;;  %v2193_v27 = vcombine.low %v2185_v7, %v2187_v4 }
 0x5fb   : > { %v2269_v39 = vcombine.low %v2261_v15, %v2268_v25  ;;  %v2207_v55 = vrot.slane %v2193_v27, %v3460_v17 }
 0x5fd   : > { %v2208_v2 = vcombine.low %v2200_v28, %v2207_v55  ;;  %2986 = vmatmul.mubr.msk.bf16.vlgmr.msra.gmra.mxu0 %vm1235_vm9, %v2269_v39 }
 0x5fe   : > { %3006 = vmatpush3.bf16.msra.mxu0 %v3885_v9  ;;  %3007 = vmatprep.mubr.msk.bf16.mxu0 %vm3207_vm7, %v3205_v5  ;;  %v2314_v9 = vcombine.low %v2187_v4, %v3202_v1 }
 0x5ff   : > { %2970 = vmatmul.mubr.msk.bf16.vlgmr.msra.gmra.mxu1 %vm1235_vm9, %v2208_v2  ;;  %3011 = vmatprep.subr.bf16.mxu0 %v3205_v5 }
 0x600   : > { %2990 = vmatpush3.bf16.msra.mxu1 %v3820_v14  ;;  %3001 = vmatprep.mubr.msk.bf16.mxu1 %vm3207_vm7, %v3205_v5  ;;  %v2321_v14 = vrot.slane %v2314_v9, %v3460_v17 }
 0x601   : > { %2991 = vmatprep.subr.bf16.mxu1 %v3205_v5 }
 0x604   : > { %2992 = vmatpush3.bf16.msra.mxu1 %v3830_v18  ;;  %v2322_v18 = vcombine.low %v2268_v25, %v2321_v14 }
 0x605   : > { %2993 = vmatprep.subr.bf16.mxu1 %v3205_v5 }
 0x608   : > { %2994 = vmatpush3.bf16.msra.mxu1 %v3839_v20 }
 0x609   : > { %2995 = vmatprep.subr.bf16.mxu1 %v3205_v5 }
 0x60c   : > { %2996 = vmatpush3.bf16.msra.mxu1 %v3846_v22 }
 0x60d   : > { %2997 = vmatprep.subr.bf16.mxu1 %v3205_v5 }
 0x610   : > { %2998 = vmatpush3.bf16.msra.mxu1 %v3853_v23 }
 0x611   : > { %2999 = vmatprep.subr.bf16.mxu1 %v3205_v5 }
 0x614   : > { %3000 = vmatpush3.bf16.msra.mxu1 %v3861_v26 }
 0x617   : > { %3002 = vmatmul.mubr.msk.bf16.vlgmr.msra.gmra.mxu1 %vm1235_vm9, %v2322_v18 }
 0x6bd   : > { %v2307_v20 = vpop.f32.mrf.mxu0 }
 0x6bf   : > { %v2246_v30 = vpop.f32.mrf.mxu1  ;;  %v2987_v24 = vpop.f32.mrf.mxu0 }
 0x6c0   : > { %v2308_v37 = vadd.f32 %v2307_v20, %v2246_v30 }
 0x6c1   : > { %v2971_v32 = vpop.f32.mrf.mxu1  ;;  %v2310_v22 = vpop.f32.mrf.mxu0 }
 0x6c3   : > { %v2249_v33 = vpop.f32.mrf.mxu1  ;;  %v2988_v1 = vpop.f32.mrf.mxu0 }
 0x6c4   : > { %v2311_v41 = vadd.f32 %v2310_v22, %v2249_v33 }
 0x6c5   : > { %v2972_v35 = vpop.f32.mrf.mxu1 }
 0x6d7   : > { %v2360_v36 = vpop.f32.mrf.mxu1 }
 0x6d8   : > { %v2367_v17 = vadd.f32 %v2360_v36, %v2308_v37 }
 0x6d9   : > { %v3003_v23 = vpop.f32.mrf.mxu1 }
 0x6da   : > { %v2369_v26 = vmax.f32 %v2367_v17, 0.0 }
 0x6db   : > { %v2363_v42 = vpop.f32.mrf.mxu1 }
 0x6dc   : > { %v2368_v43 = vadd.f32 %v2363_v42, %v2311_v41 }
 0x6dd   : > { %v3004_v44 = vpop.f32.mrf.mxu1 }
 0x6de   : > { %v2370_v40 = vmax.f32 %v2368_v43, 0.0 }
 0x6e0   : > { %v2371_v45 = vpack.c.bf16 %v2370_v40, %v2369_v26 }
 0x6e2   : > { %3008 = vmatmul.mubr.msk.bf16.vlgmr.msra.gmra.mxu0 %vm1984_vm10, %v2371_v45 }
 0x6e3   : > { %3015 = vmatprep.mubr.msk.bf16.mxu0 %vm3207_vm7, %v3205_v5  ;;  %3012 = vmatpush3.bf16.msra.mxu0 %v3138_v46 }
 0x6e4   : > { %3013 = vmatprep.subr.bf16.mxu0 %v3205_v5  ;;  %v2774_v5 = vld [vmem:[%s4056_s8] ss:$0 sm:$0xff] }
 0x6e7   : > { %3014 = vmatpush3.bf16.msra.mxu0 %v3139_v47 }
 0x7a2   : > { %v2409_v48 = vpop.f32.mrf.mxu0 }
 0x7a3   : > { %v2416_v38 = vadd.f32 %v2409_v48, %v3905_v49 }
 0x7a4   : > { %v3009_v8 = vpop.f32.mrf.mxu0 }
 0x7a5   : > { %v2418_v51 = vmax.f32 %v2416_v38, 0.0 }
 0x7a6   : > { %v2412_v16 = vpop.f32.mrf.mxu0 }
 0x7a7   : > { %v2417_v52 = vadd.f32 %v2412_v16, %v3908_v50 }
 0x7a8   : > { %v3010_v0 = vpop.f32.mrf.mxu0 }
 0x7a9   : > { %v2419_v19 = vmax.f32 %v2417_v52, 0.0 }
 0x7ab   : > { %v2420_v21 = vpack.c.bf16 %v2419_v19, %v2418_v51 }
 0x7ad   : > { %3016 = vmatmul.mubr.msk.bf16.vlgmr.msra.gmra.mxu0 %vm1136_vm8, %v2420_v21 }
 0x86d   : > { %v2481_v53 = vpop.f32.mrf.mxu0 }
 0x86e   : > { %v2482_v54 = vadd.f32 %v2774_v5, %v2481_v53 }
 0x86f   : > { %v3017_v49 = vpop.f32.mrf.mxu0 }
 0x870   : > { %v2490_v34 = vcombine.high %v2482_v54, %v2482_v54  ;;  %2495 = vst.msk [vmem:[%s325_s23] sm:$0xf] %vm2494_vm11, %v2482_v54 }
 0x871   : > { %v2484_v50 = vpop.f32.mrf.mxu0 }
 0x872   : > { %2496 = vst.msk [vmem:[%s325_s23 + $0x4] sm:$0xf] %vm2494_vm11, %v2490_v34  ;;  %v2485_v56 = vadd.f32 %v2774_v5, %v2484_v50 }
 0x873   : > { %v3018_v57 = vpop.f32.mrf.mxu0 }
 0x874   : > { %v2491_v58 = vcombine.high %v2485_v56, %v2485_v56  ;;  %2497 = vst.msk [vmem:[%s325_s23 + $0x8] sm:$0xf] %vm2494_vm11, %v2485_v56 }
 0x876   : > { %2498 = vst.msk [vmem:[%s325_s23 + $0xc] sm:$0xf] %vm2494_vm11, %v2491_v58 }
 0x877   : > { %3153 = shalt.err (!%p3150_p3)
}
 0x878   : > { %s3154_s14 = scalar_lea.hbm %s4003_s28, 256  ;;  %s3158_s16 = scalar_lea.hbm %s4057_s9, 512 }
 0x879   : > { %p3155_p4 = scmp.ne.s32.totalorder %s4003_s28, %s3154_s14  ;;  %p3159_p9 = scmp.lt.s32.totalorder %s4003_s28, %s4057_s9 }
 0x87a   : > { %p3160_p10 = scmp.lt.s32.totalorder %s3158_s16, %s3154_s14 }
 0x87b   : > { %p3156_p7 = pnand %p3155_p4, %p3298_p5 }
 0x87c   : > { %p3161_p11 = por %p3160_p10, %p3159_p9 }
 0x87d   : > { %p3157_p8 = pneg %p3156_p7 }
 0x87f   : > { %p3162_p12 = pnand %p3161_p11, %p3157_p8 }
 0x881   : > { %3165 = shalt.err (!%p3162_p12)
}
 0x882   : > { %s3209_s29 = smov 4  }
 0x883   : > { %3019 = dma.vmem_to_hbm [thread:$0]  (%p3298_p5), %s3997_s25, 256, %s4003_s28, %s4006_s13, %s3203_s24, %s3203_s24, %s3209_s29  }
 0x884 PF: > { %p3025_p13 = scmp.ge.s32.totalorder %s3200_s12, 2  ;;  %s2528_s21 = sand.u32 1, %s3188_s30  }
 0x885   : > { %s2529_s22 = scalar_lea.sflag [#allocation3], %s2528_s21 }
 0x886   : > { %p3022_p0 = pnand %p3025_p13, %p3302_p6 }
 0x888   : > { %p3023_p1 = pneg %p3022_p0 }
 0x88a   : > { %3183 = dma.done.wait (%p3023_p1), %s2529_s22, 256  }
 0x88b   : > { %3185 = vsyncadd (%p3023_p1), %s2529_s22, 4294967040  ;;  %p19_p2 = scmp.ge.s32.totalorder %s3285_s15, 4   ;;  %s4064_s30 = smov %s3192_s10 }
 0x88c   : > { %s4065_s10 = smov %s3196_s11  ;;  %s4066_s11 = smov %s3296_s18 }
 0x88d   : > { %s4067_s12 = smov %s3285_s15  ;;  %21 = sbr.rel (!%p19_p2) target bundleno = 3 (0x3), region = 97 }
 0x892   :  { %2534 = vsyncpa [#allocation3], 1 }
 0x893   :  { %2536 = vsyncpa [#allocation3 + $0x1], 1 }

</bundles_post_ra>
